<compile_context>
chip_gen: v7x
topology: tpu7x:2x2x1
jax: 0.10.0
libtpu: 0.0.40
codegen_flags: <defaults>
</compile_context>

<pallas_src>
import math

import jax
import jax.numpy as jnp
import numpy as np
from jax.experimental import pallas as pl
from jax.experimental.pallas import tpu as pltpu

# ----------------------------- configuration --------------------------------
D_MODEL = 32
IMG_SIZE = (16, 16)
PATCH_SIZE = (4, 4)
N_CHANNELS = 4
N_HEADS = 2
N_LAYERS = 2                     # also the MLP expansion factor in the module
HEAD_SIZE = D_MODEL // N_HEADS
N_PATCHES = (IMG_SIZE[0] // PATCH_SIZE[0]) * (IMG_SIZE[1] // PATCH_SIZE[1])
SEQ = N_PATCHES                  # include_cls_token=False
MLP_HIDDEN = N_LAYERS * D_MODEL
K_PATCH = N_CHANNELS * PATCH_SIZE[0] * PATCH_SIZE[1]
LN_EPS = 1e-5
# NOTE: matches the PyTorch module exactly — each head's Q/K/V is d_model wide,
# but the softmax scale is 1/sqrt(head_size) = 1/sqrt(d_model // n_heads).
ATTN_SCALE = 1.0 / math.sqrt(HEAD_SIZE)

# Dtype of MXU matmul operands.  f32 keeps the numeric check tight; on v6e/v7x
# set to jnp.bfloat16 (activations, LN, softmax, residuals stay f32 — required
# on v5e where the VPU/EUP have no bf16 path).
MATMUL_DTYPE = jnp.float32

# Target rows (MXU M-dim) per grid block: >=128 fills v5e's 128-wide MXU,
# 256 fills v6e/v7x's 256-wide MXU.
TARGET_ROWS_PER_BLOCK = 256


# --------------------------- Pallas kernel -----------------------------------
def _layernorm(x, g, b):
    m = jnp.mean(x, axis=-1, keepdims=True)
    v = jnp.mean((x - m) * (x - m), axis=-1, keepdims=True)
    return (x - m) * jax.lax.rsqrt(v + LN_EPS) * g + b


def vit_fused_kernel(patches_ref, pe_ref, b_pe_ref, w_pe_ref,
                     w_qkv_ref, b_qkv_ref, w_o_ref,
                     w_m1_ref, w_m2_ref, vec_ref, o_ref):
    # patches_ref: (Nb, S, K)     pe_ref: (S, D)     b_pe_ref: (1, D)
    # w_pe_ref:   (K, D)
    # w_qkv_ref:  (L, D, 3*H*D)   b_qkv_ref: (L, 1, 3*H*D)   w_o_ref: (L, H*D, D)
    # w_m1_ref:   (L, D, Dh)      w_m2_ref:  (L, Dh, D)      vec_ref: (L, 8, Dh)
    # o_ref:      (Nb, S, D)
    Nb = patches_ref.shape[0]
    rows = Nb * SEQ
    D = D_MODEL
    HD = N_HEADS * D_MODEL
    mm_dt = w_pe_ref.dtype                      # matmul operand dtype (f32 or bf16)

    # ---- patch embedding (conv-as-matmul) + positional encoding + conv bias ----
    patches = patches_ref[...].reshape(rows, K_PATCH)
    x = jnp.dot(patches.astype(mm_dt), w_pe_ref[...],
                preferred_element_type=jnp.float32)          # (rows, D) f32
    # broadcast pe per image inside the kernel (no B-times tile in the wrapper)
    x = (x.reshape(Nb, SEQ, D) + pe_ref[...] + b_pe_ref[...]).reshape(rows, D)

    for l in range(N_LAYERS):                   # static unroll over layers
        vec = vec_ref[l]                        # (8, Dh)
        ln1_g, ln1_b = vec[0:1, :D], vec[1:2, :D]
        ln2_g, ln2_b = vec[2:3, :D], vec[3:4, :D]
        bo, b2 = vec[4:5, :D], vec[5:6, :D]
        b1 = vec[6:7, :]                        # (1, Dh)

        # ---- pre-LN multi-head self-attention (each head uses full d_model) ----
        h = _layernorm(x, ln1_g, ln1_b)
        qkv = jnp.dot(h.astype(mm_dt), w_qkv_ref[l],
                      preferred_element_type=jnp.float32) + b_qkv_ref[l]  # (rows, 3*H*D)

        heads = []
        for hd in range(N_HEADS):               # static unroll over heads
            q = qkv[:, hd * D:(hd + 1) * D].reshape(Nb, SEQ, D)
            k = qkv[:, HD + hd * D:HD + (hd + 1) * D].reshape(Nb, SEQ, D)
            v = qkv[:, 2 * HD + hd * D:2 * HD + (hd + 1) * D].reshape(Nb, SEQ, D)
            # per-image batched attention — O(B*S^2), no block-diagonal mask
            s = jnp.einsum('bqd,bkd->bqk', q.astype(mm_dt), k.astype(mm_dt),
                           preferred_element_type=jnp.float32) * ATTN_SCALE
            s = s - jnp.max(s, axis=-1, keepdims=True)
            p = jnp.exp(s)
            p = p / jnp.sum(p, axis=-1, keepdims=True)        # exact divide (f32)
            head = jnp.einsum('bqk,bkd->bqd', p.astype(mm_dt), v.astype(mm_dt),
                              preferred_element_type=jnp.float32)
            heads.append(head.reshape(rows, D))
        # fuse the per-head output projections into ONE (rows, H*D) x (H*D, D) dot
        cat = jnp.concatenate(heads, axis=-1)                 # (rows, H*D) = 64 lanes
        attn = jnp.dot(cat.astype(mm_dt), w_o_ref[l],
                       preferred_element_type=jnp.float32) + bo
        # TODO(synk): nn.Dropout(0.1) is identity in eval mode; no RNG drop applied.
        x = x + attn

        # ---- pre-LN MLP (Linear -> ReLU -> Linear) + residual ----
        h2 = _layernorm(x, ln2_g, ln2_b)
        m = jnp.dot(h2.astype(mm_dt), w_m1_ref[l],
                    preferred_element_type=jnp.float32) + b1
        m = jnp.maximum(m, 0.0)
        x = x + jnp.dot(m.astype(mm_dt), w_m2_ref[l],
                        preferred_element_type=jnp.float32) + b2

    o_ref[...] = x.reshape(Nb, SEQ, D)


# ------------------------------ JAX glue -------------------------------------
def extract_patches(x_nchw):
    """NCHW image -> (B, N_patches, C*ph*pw), row-major patch order, (c,u,v) flatten."""
    B, C, Hh, Ww = x_nchw.shape
    ph, pw = PATCH_SIZE
    Hp, Wp = Hh // ph, Ww // pw
    x = x_nchw.reshape(B, C, Hp, ph, Wp, pw)
    x = jnp.transpose(x, (0, 2, 4, 1, 3, 5))        # (B, Hp, Wp, C, ph, pw)
    return x.reshape(B, Hp * Wp, C * ph * pw)


def build_pos_encoding():
    pos = np.arange(SEQ, dtype=np.float64)[:, None]
    i = np.arange(D_MODEL, dtype=np.float64)[None, :]
    even = np.sin(pos / 10000 ** (i / D_MODEL))
    odd = np.cos(pos / 10000 ** ((i - 1) / D_MODEL))
    pe = np.where((np.arange(D_MODEL)[None, :] % 2) == 0, even, odd)
    return jnp.asarray(pe, dtype=jnp.float32)       # (SEQ, D_MODEL)


def init_params(key):
    def nrm(key, shape, scale=0.05):
        return scale * jax.random.normal(key, shape, dtype=jnp.float32)

    keys = iter(jax.random.split(key, 8 + N_LAYERS * 16))
    params = {
        'w_pe': nrm(next(keys), (K_PATCH, D_MODEL)),
        'b_pe': nrm(next(keys), (1, D_MODEL)),
        'pe': build_pos_encoding(),
        'layers': [],
    }
    for _ in range(N_LAYERS):
        lp = {
            'ln1_g': jnp.ones((1, D_MODEL), jnp.float32),
            'ln1_b': jnp.zeros((1, D_MODEL), jnp.float32),
            'wq': nrm(next(keys), (N_HEADS, D_MODEL, D_MODEL)),
            'bq': nrm(next(keys), (N_HEADS, 1, D_MODEL)),
            'wk': nrm(next(keys), (N_HEADS, D_MODEL, D_MODEL)),
            'bk': nrm(next(keys), (N_HEADS, 1, D_MODEL)),
            'wv': nrm(next(keys), (N_HEADS, D_MODEL, D_MODEL)),
            'bv': nrm(next(keys), (N_HEADS, 1, D_MODEL)),
            'wo': nrm(next(keys), (N_HEADS * D_MODEL, D_MODEL)),
            'bo': nrm(next(keys), (1, D_MODEL)),
            'ln2_g': jnp.ones((1, D_MODEL), jnp.float32),
            'ln2_b': jnp.zeros((1, D_MODEL), jnp.float32),
            'w1': nrm(next(keys), (D_MODEL, MLP_HIDDEN)),
            'b1': nrm(next(keys), (1, MLP_HIDDEN)),
            'w2': nrm(next(keys), (MLP_HIDDEN, D_MODEL)),
            'b2': nrm(next(keys), (1, D_MODEL)),
        }
        params['layers'].append(lp)
    return params


def pack_params(params, matmul_dtype=MATMUL_DTYPE):
    """Pack per-layer weights into a few L-stacked slabs (one-time prep).

    Matmul slabs (w_pe/w_qkv/w_o/w_m1/w_m2) are stored in `matmul_dtype`
    (bf16 on v6e/v7x halves VMEM traffic); biases/LN params/pos-enc stay f32.
    """
    assert MLP_HIDDEN >= D_MODEL
    H, Dh = N_HEADS, MLP_HIDDEN
    pad = lambda a: jnp.pad(a, ((0, 0), (0, Dh - a.shape[1])))
    w_qkv, b_qkv, w_o, w_m1, w_m2, vec = [], [], [], [], [], []
    for p in params['layers']:
        w_qkv.append(jnp.concatenate(
            [p['wq'][h] for h in range(H)]
            + [p['wk'][h] for h in range(H)]
            + [p['wv'][h] for h in range(H)], axis=1))            # (D, 3*H*D)
        b_qkv.append(jnp.concatenate(
            [p['bq'][h] for h in range(H)]
            + [p['bk'][h] for h in range(H)]
            + [p['bv'][h] for h in range(H)], axis=1))            # (1, 3*H*D)
        w_o.append(p['wo'])                                       # (H*D, D)
        w_m1.append(p['w1'])                                      # (D, Dh)
        w_m2.append(p['w2'])                                      # (Dh, D)
        vec.append(jnp.concatenate(
            [pad(p['ln1_g']), pad(p['ln1_b']),
             pad(p['ln2_g']), pad(p['ln2_b']),
             pad(p['bo']), pad(p['b2']),
             p['b1'], jnp.zeros((1, Dh), jnp.float32)], axis=0))  # (8, Dh)
    stack = lambda xs, dt: jnp.stack(xs, axis=0).astype(dt)
    return {
        'w_pe': params['w_pe'].astype(matmul_dtype),
        'b_pe': params['b_pe'], 'pe': params['pe'],
        'w_qkv': stack(w_qkv, matmul_dtype), 'b_qkv': stack(b_qkv, jnp.float32),
        'w_o': stack(w_o, matmul_dtype),
        'w_m1': stack(w_m1, matmul_dtype), 'w_m2': stack(w_m2, matmul_dtype),
        'vec': stack(vec, jnp.float32),
    }


def _imgs_per_block(batch, target_rows=TARGET_ROWS_PER_BLOCK):
    """Largest divisor of `batch` whose row count (imgs*SEQ) is <= target_rows."""
    cap = max(1, target_rows // SEQ)
    best = 1
    for d in range(1, min(batch, cap) + 1):
        if batch % d == 0:
            best = d
    return best


def vit_forward_pallas(x_nchw, packed):
    B = x_nchw.shape[0]
    patches = extract_patches(x_nchw)                              # (B, S, K)
    nb = _imgs_per_block(B)                                        # images per grid block
    n_chunks = B // nb
    L, HD, Dh = N_LAYERS, N_HEADS * D_MODEL, MLP_HIDDEN

    inputs = (patches, packed['pe'], packed['b_pe'], packed['w_pe'],
              packed['w_qkv'], packed['b_qkv'], packed['w_o'],
              packed['w_m1'], packed['w_m2'], packed['vec'])

    # Advisory cost estimate (helps XLA schedule the custom call in bigger graphs).
    rows = B * SEQ
    flops = int(2 * rows * K_PATCH * D_MODEL + N_LAYERS * (
        2 * rows * D_MODEL * 3 * HD                      # fused QKV
        + N_HEADS * 2 * 2 * B * SEQ * SEQ * D_MODEL      # scores + p@v
        + 2 * rows * HD * D_MODEL                        # output projection
        + 2 * 2 * rows * D_MODEL * Dh))                  # MLP
    transcendentals = int(N_LAYERS * N_HEADS * B * SEQ * SEQ)
    bytes_accessed = int(sum(int(a.size) * a.dtype.itemsize for a in inputs)
                         + rows * D_MODEL * 4)

    grid_spec = pltpu.PrefetchScalarGridSpec(
        num_scalar_prefetch=0,
        grid=(n_chunks,),
        in_specs=[
            # activations: blocked by batch chunk (double-buffered by Pallas)
            pl.BlockSpec((nb, SEQ, K_PATCH), lambda i: (i, 0, 0)),
            # pos-enc / biases / weights: constant block index -> DMA once, stay resident
            pl.BlockSpec((SEQ, D_MODEL), lambda i: (0, 0)),
            pl.BlockSpec((1, D_MODEL), lambda i: (0, 0)),
            pl.BlockSpec((K_PATCH, D_MODEL), lambda i: (0, 0)),
            pl.BlockSpec((L, D_MODEL, 3 * HD), lambda i: (0, 0, 0)),
            pl.BlockSpec((L, 1, 3 * HD), lambda i: (0, 0, 0)),
            pl.BlockSpec((L, HD, D_MODEL), lambda i: (0, 0, 0)),
            pl.BlockSpec((L, D_MODEL, Dh), lambda i: (0, 0, 0)),
            pl.BlockSpec((L, Dh, D_MODEL), lambda i: (0, 0, 0)),
            pl.BlockSpec((L, 8, Dh), lambda i: (0, 0, 0)),
        ],
        out_specs=pl.BlockSpec((nb, SEQ, D_MODEL), lambda i: (i, 0, 0)),
    )

    out = pl.pallas_call(
        vit_fused_kernel,
        out_shape=jax.ShapeDtypeStruct((B, SEQ, D_MODEL), jnp.float32),
        grid_spec=grid_spec,
        compiler_params=pltpu.CompilerParams(
            dimension_semantics=("parallel",)),           # v7x: chunks split across 2 TCs
        cost_estimate=pl.CostEstimate(flops=flops,
                                      transcendentals=transcendentals,
                                      bytes_accessed=bytes_accessed),
    )(*inputs)
    return out                                            # (B, SEQ, D_MODEL)


# ------------------------- pure-JAX reference --------------------------------
def _ln_ref(x, g, b):
    m = jnp.mean(x, -1, keepdims=True)
    v = jnp.mean((x - m) ** 2, -1, keepdims=True)
    return (x - m) / jnp.sqrt(v + LN_EPS) * g + b


def vit_forward_ref(x_nchw, params):
    patches = extract_patches(x_nchw)
    h = patches @ params['w_pe'] + params['b_pe'] + params['pe']
    for p in params['layers']:
        x = h
        hl = _ln_ref(x, p['ln1_g'], p['ln1_b'])
        heads = []
        for hd in range(N_HEADS):
            q = hl @ p['wq'][hd] + p['bq'][hd]
            k = hl @ p['wk'][hd] + p['bk'][hd]
            v = hl @ p['wv'][hd] + p['bv'][hd]
            s = (q @ jnp.swapaxes(k, -1, -2)) * ATTN_SCALE
            a = jax.nn.softmax(s, axis=-1)
            heads.append(a @ v)
        cat = jnp.concatenate(heads, axis=-1)
        x = x + (cat @ p['wo'] + p['bo'])
        h2 = _ln_ref(x, p['ln2_g'], p['ln2_b'])
        m = jax.nn.relu(h2 @ p['w1'] + p['b1']) @ p['w2'] + p['b2']
        h = x + m
    return h


# ---------------------------------- main --------------------------------------
if __name__ == "__main__":
    key = jax.random.PRNGKey(0)
    k_x, k_p = jax.random.split(key)
    x = jax.random.normal(k_x, (2, N_CHANNELS, IMG_SIZE[0], IMG_SIZE[1]), jnp.float32)
    params = init_params(k_p)
    packed = pack_params(params)

    out = jax.block_until_ready(vit_forward_pallas(x, packed))
    ref = jax.block_until_ready(vit_forward_ref(x, params))

    assert out.shape == (2, SEQ, D_MODEL), out.shape
    # All-f32 matmuls + exact softmax divide -> tight tolerance.
    np.testing.assert_allclose(np.asarray(out), np.asarray(ref), atol=1e-4, rtol=1e-4)

    print("KERNEL_OK")
</pallas_src>

<mosaic_0001>
module attributes {stable_mosaic.version = 11 : i64} {
  func.func @vit_fused_kernel(%arg0: i32, %arg1: memref<2x16x64xf32, #tpu.memory_space<vmem>>, %arg2: memref<16x32xf32, #tpu.memory_space<vmem>>, %arg3: memref<1x32xf32, #tpu.memory_space<vmem>>, %arg4: memref<64x32xf32, #tpu.memory_space<vmem>>, %arg5: memref<2x32x192xf32, #tpu.memory_space<vmem>>, %arg6: memref<2x1x192xf32, #tpu.memory_space<vmem>>, %arg7: memref<2x64x32xf32, #tpu.memory_space<vmem>>, %arg8: memref<2x32x64xf32, #tpu.memory_space<vmem>>, %arg9: memref<2x64x32xf32, #tpu.memory_space<vmem>>, %arg10: memref<2x8x64xf32, #tpu.memory_space<vmem>>, %arg11: memref<2x16x32xf32, #tpu.memory_space<vmem>>) attributes {dimension_semantics = [#tpu.dimension_semantics<parallel>], iteration_bounds = array<i64: 1>, scalar_prefetch = 0 : i64, scratch_operands = 0 : i64, tpu.core_type = #tpu.core_type<tc>, window_params = [{transform_indices = @transform_0, window_bounds = array<i64: 2, 16, 64>}, {pipeline_mode = #tpu.pipeline_mode<synchronous>, transform_indices = @transform_1, window_bounds = array<i64: 16, 32>}, {pipeline_mode = #tpu.pipeline_mode<synchronous>, transform_indices = @transform_2, window_bounds = array<i64: 1, 32>}, {pipeline_mode = #tpu.pipeline_mode<synchronous>, transform_indices = @transform_3, window_bounds = array<i64: 64, 32>}, {pipeline_mode = #tpu.pipeline_mode<synchronous>, transform_indices = @transform_4, window_bounds = array<i64: 2, 32, 192>}, {pipeline_mode = #tpu.pipeline_mode<synchronous>, transform_indices = @transform_5, window_bounds = array<i64: 2, 1, 192>}, {pipeline_mode = #tpu.pipeline_mode<synchronous>, transform_indices = @transform_6, window_bounds = array<i64: 2, 64, 32>}, {pipeline_mode = #tpu.pipeline_mode<synchronous>, transform_indices = @transform_7, window_bounds = array<i64: 2, 32, 64>}, {pipeline_mode = #tpu.pipeline_mode<synchronous>, transform_indices = @transform_8, window_bounds = array<i64: 2, 64, 32>}, {pipeline_mode = #tpu.pipeline_mode<synchronous>, transform_indices = @transform_9, window_bounds = array<i64: 2, 8, 64>}, {transform_indices = @transform_10, window_bounds = array<i64: 2, 16, 32>}]} {
    %c0 = arith.constant 0 : index
    %c0_0 = arith.constant 0 : index
    %c0_1 = arith.constant 0 : index
    %0 = vector.load %arg1[%c0, %c0_0, %c0_1] : memref<2x16x64xf32, #tpu.memory_space<vmem>>, vector<2x16x64xf32>
    %1 = vector.shape_cast %0 : vector<2x16x64xf32> to vector<32x64xf32>
    %c0_2 = arith.constant 0 : index
    %c0_3 = arith.constant 0 : index
    %2 = vector.load %arg4[%c0_2, %c0_3] : memref<64x32xf32, #tpu.memory_space<vmem>>, vector<64x32xf32>
    %cst = arith.constant dense<0.000000e+00> : vector<32x32xf32>
    %3 = tpu.matmul %1, %2, %cst {dimension_numbers = #tpu.dot_dimension_numbers<[1], [0], [0], [1], [0, 0, 1, 1], [], []>} : vector<32x64xf32>, vector<64x32xf32>, vector<32x32xf32> -> vector<32x32xf32>
    %4 = vector.shape_cast %3 : vector<32x32xf32> to vector<2x16x32xf32>
    %c0_4 = arith.constant 0 : index
    %c0_5 = arith.constant 0 : index
    %5 = vector.load %arg2[%c0_4, %c0_5] : memref<16x32xf32, #tpu.memory_space<vmem>>, vector<16x32xf32>
    %6 = vector.shape_cast %5 : vector<16x32xf32> to vector<1x16x32xf32>
    %7 = vector.broadcast %6 : vector<1x16x32xf32> to vector<2x16x32xf32>
    %8 = arith.addf %4, %7 : vector<2x16x32xf32>
    %c0_6 = arith.constant 0 : index
    %c0_7 = arith.constant 0 : index
    %9 = vector.load %arg3[%c0_6, %c0_7] : memref<1x32xf32, #tpu.memory_space<vmem>>, vector<1x32xf32>
    %10 = vector.shape_cast %9 : vector<1x32xf32> to vector<1x1x32xf32>
    %11 = vector.broadcast %10 : vector<1x1x32xf32> to vector<2x16x32xf32>
    %12 = arith.addf %8, %11 : vector<2x16x32xf32>
    %13 = vector.shape_cast %12 : vector<2x16x32xf32> to vector<32x32xf32>
    %c0_8 = arith.constant 0 : index
    %c0_9 = arith.constant 0 : index
    %c0_10 = arith.constant 0 : index
    %14 = vector.load %arg10[%c0_8, %c0_9, %c0_10] : memref<2x8x64xf32, #tpu.memory_space<vmem>>, vector<1x8x64xf32>
    %15 = vector.shape_cast %14 : vector<1x8x64xf32> to vector<8x64xf32>
    %16 = vector.extract_strided_slice %15 {offsets = [0, 0], sizes = [1, 32], strides = [1, 1]} : vector<8x64xf32> to vector<1x32xf32>
    %17 = vector.extract_strided_slice %15 {offsets = [1, 0], sizes = [1, 32], strides = [1, 1]} : vector<8x64xf32> to vector<1x32xf32>
    %18 = vector.extract_strided_slice %15 {offsets = [2, 0], sizes = [1, 32], strides = [1, 1]} : vector<8x64xf32> to vector<1x32xf32>
    %19 = vector.extract_strided_slice %15 {offsets = [3, 0], sizes = [1, 32], strides = [1, 1]} : vector<8x64xf32> to vector<1x32xf32>
    %20 = vector.extract_strided_slice %15 {offsets = [4, 0], sizes = [1, 32], strides = [1, 1]} : vector<8x64xf32> to vector<1x32xf32>
    %21 = vector.extract_strided_slice %15 {offsets = [5, 0], sizes = [1, 32], strides = [1, 1]} : vector<8x64xf32> to vector<1x32xf32>
    %22 = vector.extract_strided_slice %15 {offsets = [6, 0], sizes = [1, 64], strides = [1, 1]} : vector<8x64xf32> to vector<1x64xf32>
    %cst_11 = arith.constant dense<0.000000e+00> : vector<32xf32>
    %23 = vector.multi_reduction <add>, %13, %cst_11 [1] : vector<32x32xf32> to vector<32xf32>
    %24 = vector.shape_cast %23 : vector<32xf32> to vector<32x1xf32>
    %cst_12 = arith.constant 3.200000e+01 : f32
    %25 = vector.broadcast %cst_12 : f32 to vector<32x1xf32>
    %26 = arith.divf %24, %25 : vector<32x1xf32>
    %27 = vector.broadcast %26 : vector<32x1xf32> to vector<32x32xf32>
    %28 = arith.subf %13, %27 : vector<32x32xf32>
    %29 = vector.broadcast %26 : vector<32x1xf32> to vector<32x32xf32>
    %30 = arith.subf %13, %29 : vector<32x32xf32>
    %31 = arith.mulf %28, %30 : vector<32x32xf32>
    %cst_13 = arith.constant dense<0.000000e+00> : vector<32xf32>
    %32 = vector.multi_reduction <add>, %31, %cst_13 [1] : vector<32x32xf32> to vector<32xf32>
    %33 = vector.shape_cast %32 : vector<32xf32> to vector<32x1xf32>
    %cst_14 = arith.constant 3.200000e+01 : f32
    %34 = vector.broadcast %cst_14 : f32 to vector<32x1xf32>
    %35 = arith.divf %33, %34 : vector<32x1xf32>
    %36 = vector.broadcast %26 : vector<32x1xf32> to vector<32x32xf32>
    %37 = arith.subf %13, %36 : vector<32x32xf32>
    %cst_15 = arith.constant 9.99999974E-6 : f32
    %38 = vector.broadcast %cst_15 : f32 to vector<32x1xf32>
    %39 = arith.addf %35, %38 : vector<32x1xf32>
    %40 = math.rsqrt %39 : vector<32x1xf32>
    %41 = vector.broadcast %40 : vector<32x1xf32> to vector<32x32xf32>
    %42 = arith.mulf %37, %41 : vector<32x32xf32>
    %43 = vector.broadcast %16 : vector<1x32xf32> to vector<32x32xf32>
    %44 = arith.mulf %42, %43 : vector<32x32xf32>
    %45 = vector.broadcast %17 : vector<1x32xf32> to vector<32x32xf32>
    %46 = arith.addf %44, %45 : vector<32x32xf32>
    %c0_16 = arith.constant 0 : index
    %c0_17 = arith.constant 0 : index
    %c0_18 = arith.constant 0 : index
    %47 = vector.load %arg5[%c0_16, %c0_17, %c0_18] : memref<2x32x192xf32, #tpu.memory_space<vmem>>, vector<1x32x192xf32>
    %48 = vector.shape_cast %47 : vector<1x32x192xf32> to vector<32x192xf32>
    %cst_19 = arith.constant dense<0.000000e+00> : vector<32x192xf32>
    %49 = tpu.matmul %46, %48, %cst_19 {dimension_numbers = #tpu.dot_dimension_numbers<[1], [0], [0], [1], [0, 0, 1, 1], [], []>} : vector<32x32xf32>, vector<32x192xf32>, vector<32x192xf32> -> vector<32x192xf32>
    %c0_20 = arith.constant 0 : index
    %c0_21 = arith.constant 0 : index
    %c0_22 = arith.constant 0 : index
    %50 = vector.load %arg6[%c0_20, %c0_21, %c0_22] : memref<2x1x192xf32, #tpu.memory_space<vmem>>, vector<1x1x192xf32>
    %51 = vector.shape_cast %50 : vector<1x1x192xf32> to vector<1x192xf32>
    %52 = vector.broadcast %51 : vector<1x192xf32> to vector<32x192xf32>
    %53 = arith.addf %49, %52 : vector<32x192xf32>
    %54 = vector.extract_strided_slice %53 {offsets = [0, 0], sizes = [32, 32], strides = [1, 1]} : vector<32x192xf32> to vector<32x32xf32>
    %55 = vector.shape_cast %54 : vector<32x32xf32> to vector<2x16x32xf32>
    %56 = vector.extract_strided_slice %53 {offsets = [0, 64], sizes = [32, 32], strides = [1, 1]} : vector<32x192xf32> to vector<32x32xf32>
    %57 = vector.shape_cast %56 : vector<32x32xf32> to vector<2x16x32xf32>
    %58 = vector.extract_strided_slice %53 {offsets = [0, 128], sizes = [32, 32], strides = [1, 1]} : vector<32x192xf32> to vector<32x32xf32>
    %59 = vector.shape_cast %58 : vector<32x32xf32> to vector<2x16x32xf32>
    "tpu.trace_start"() <{level = 10 : i32, message = "bqd,bkd->bqk"}> : () -> ()
    %cst_23 = arith.constant dense<0.000000e+00> : vector<2x16x16xf32>
    %60 = tpu.matmul %55, %57, %cst_23 {dimension_numbers = #tpu.dot_dimension_numbers<[2], [2], [1], [1], [0, 0, 0, 1, 1, 1], [0], [0]>} : vector<2x16x32xf32>, vector<2x16x32xf32>, vector<2x16x16xf32> -> vector<2x16x16xf32>
    "tpu.trace_stop"() : () -> ()
    %cst_24 = arith.constant 2.500000e-01 : f32
    %61 = vector.broadcast %cst_24 : f32 to vector<2x16x16xf32>
    %62 = arith.mulf %60, %61 : vector<2x16x16xf32>
    %cst_25 = arith.constant dense<0xFF800000> : vector<2x16xf32>
    %63 = vector.multi_reduction <maximumf>, %62, %cst_25 [2] : vector<2x16x16xf32> to vector<2x16xf32>
    %64 = vector.shape_cast %63 : vector<2x16xf32> to vector<2x16x1xf32>
    %65 = vector.broadcast %64 : vector<2x16x1xf32> to vector<2x16x16xf32>
    %66 = arith.subf %62, %65 : vector<2x16x16xf32>
    %67 = math.exp %66 : vector<2x16x16xf32>
    %cst_26 = arith.constant dense<0.000000e+00> : vector<2x16xf32>
    %68 = vector.multi_reduction <add>, %67, %cst_26 [2] : vector<2x16x16xf32> to vector<2x16xf32>
    %69 = vector.shape_cast %68 : vector<2x16xf32> to vector<2x16x1xf32>
    %70 = vector.broadcast %69 : vector<2x16x1xf32> to vector<2x16x16xf32>
    %71 = arith.divf %67, %70 : vector<2x16x16xf32>
    "tpu.trace_start"() <{level = 10 : i32, message = "bqk,bkd->bqd"}> : () -> ()
    %cst_27 = arith.constant dense<0.000000e+00> : vector<2x16x32xf32>
    %72 = tpu.matmul %71, %59, %cst_27 {dimension_numbers = #tpu.dot_dimension_numbers<[2], [1], [1], [2], [0, 0, 0, 1, 1, 2], [0], [0]>} : vector<2x16x16xf32>, vector<2x16x32xf32>, vector<2x16x32xf32> -> vector<2x16x32xf32>
    "tpu.trace_stop"() : () -> ()
    %73 = vector.shape_cast %72 : vector<2x16x32xf32> to vector<32x32xf32>
    %74 = vector.extract_strided_slice %53 {offsets = [0, 32], sizes = [32, 32], strides = [1, 1]} : vector<32x192xf32> to vector<32x32xf32>
    %75 = vector.shape_cast %74 : vector<32x32xf32> to vector<2x16x32xf32>
    %76 = vector.extract_strided_slice %53 {offsets = [0, 96], sizes = [32, 32], strides = [1, 1]} : vector<32x192xf32> to vector<32x32xf32>
    %77 = vector.shape_cast %76 : vector<32x32xf32> to vector<2x16x32xf32>
    %78 = vector.extract_strided_slice %53 {offsets = [0, 160], sizes = [32, 32], strides = [1, 1]} : vector<32x192xf32> to vector<32x32xf32>
    %79 = vector.shape_cast %78 : vector<32x32xf32> to vector<2x16x32xf32>
    "tpu.trace_start"() <{level = 10 : i32, message = "bqd,bkd->bqk"}> : () -> ()
    %cst_28 = arith.constant dense<0.000000e+00> : vector<2x16x16xf32>
    %80 = tpu.matmul %75, %77, %cst_28 {dimension_numbers = #tpu.dot_dimension_numbers<[2], [2], [1], [1], [0, 0, 0, 1, 1, 1], [0], [0]>} : vector<2x16x32xf32>, vector<2x16x32xf32>, vector<2x16x16xf32> -> vector<2x16x16xf32>
    "tpu.trace_stop"() : () -> ()
    %cst_29 = arith.constant 2.500000e-01 : f32
    %81 = vector.broadcast %cst_29 : f32 to vector<2x16x16xf32>
    %82 = arith.mulf %80, %81 : vector<2x16x16xf32>
    %cst_30 = arith.constant dense<0xFF800000> : vector<2x16xf32>
    %83 = vector.multi_reduction <maximumf>, %82, %cst_30 [2] : vector<2x16x16xf32> to vector<2x16xf32>
    %84 = vector.shape_cast %83 : vector<2x16xf32> to vector<2x16x1xf32>
    %85 = vector.broadcast %84 : vector<2x16x1xf32> to vector<2x16x16xf32>
    %86 = arith.subf %82, %85 : vector<2x16x16xf32>
    %87 = math.exp %86 : vector<2x16x16xf32>
    %cst_31 = arith.constant dense<0.000000e+00> : vector<2x16xf32>
    %88 = vector.multi_reduction <add>, %87, %cst_31 [2] : vector<2x16x16xf32> to vector<2x16xf32>
    %89 = vector.shape_cast %88 : vector<2x16xf32> to vector<2x16x1xf32>
    %90 = vector.broadcast %89 : vector<2x16x1xf32> to vector<2x16x16xf32>
    %91 = arith.divf %87, %90 : vector<2x16x16xf32>
    "tpu.trace_start"() <{level = 10 : i32, message = "bqk,bkd->bqd"}> : () -> ()
    %cst_32 = arith.constant dense<0.000000e+00> : vector<2x16x32xf32>
    %92 = tpu.matmul %91, %79, %cst_32 {dimension_numbers = #tpu.dot_dimension_numbers<[2], [1], [1], [2], [0, 0, 0, 1, 1, 2], [0], [0]>} : vector<2x16x16xf32>, vector<2x16x32xf32>, vector<2x16x32xf32> -> vector<2x16x32xf32>
    "tpu.trace_stop"() : () -> ()
    %93 = vector.shape_cast %92 : vector<2x16x32xf32> to vector<32x32xf32>
    %94 = tpu.concatenate %73, %93 in 1 : vector<32x32xf32>, vector<32x32xf32> -> vector<32x64xf32>
    %c0_33 = arith.constant 0 : index
    %c0_34 = arith.constant 0 : index
    %c0_35 = arith.constant 0 : index
    %95 = vector.load %arg7[%c0_33, %c0_34, %c0_35] : memref<2x64x32xf32, #tpu.memory_space<vmem>>, vector<1x64x32xf32>
    %96 = vector.shape_cast %95 : vector<1x64x32xf32> to vector<64x32xf32>
    %cst_36 = arith.constant dense<0.000000e+00> : vector<32x32xf32>
    %97 = tpu.matmul %94, %96, %cst_36 {dimension_numbers = #tpu.dot_dimension_numbers<[1], [0], [0], [1], [0, 0, 1, 1], [], []>} : vector<32x64xf32>, vector<64x32xf32>, vector<32x32xf32> -> vector<32x32xf32>
    %98 = vector.broadcast %20 : vector<1x32xf32> to vector<32x32xf32>
    %99 = arith.addf %97, %98 : vector<32x32xf32>
    %100 = arith.addf %13, %99 : vector<32x32xf32>
    %cst_37 = arith.constant dense<0.000000e+00> : vector<32xf32>
    %101 = vector.multi_reduction <add>, %100, %cst_37 [1] : vector<32x32xf32> to vector<32xf32>
    %102 = vector.shape_cast %101 : vector<32xf32> to vector<32x1xf32>
    %cst_38 = arith.constant 3.200000e+01 : f32
    %103 = vector.broadcast %cst_38 : f32 to vector<32x1xf32>
    %104 = arith.divf %102, %103 : vector<32x1xf32>
    %105 = vector.broadcast %104 : vector<32x1xf32> to vector<32x32xf32>
    %106 = arith.subf %100, %105 : vector<32x32xf32>
    %107 = vector.broadcast %104 : vector<32x1xf32> to vector<32x32xf32>
    %108 = arith.subf %100, %107 : vector<32x32xf32>
    %109 = arith.mulf %106, %108 : vector<32x32xf32>
    %cst_39 = arith.constant dense<0.000000e+00> : vector<32xf32>
    %110 = vector.multi_reduction <add>, %109, %cst_39 [1] : vector<32x32xf32> to vector<32xf32>
    %111 = vector.shape_cast %110 : vector<32xf32> to vector<32x1xf32>
    %cst_40 = arith.constant 3.200000e+01 : f32
    %112 = vector.broadcast %cst_40 : f32 to vector<32x1xf32>
    %113 = arith.divf %111, %112 : vector<32x1xf32>
    %114 = vector.broadcast %104 : vector<32x1xf32> to vector<32x32xf32>
    %115 = arith.subf %100, %114 : vector<32x32xf32>
    %cst_41 = arith.constant 9.99999974E-6 : f32
    %116 = vector.broadcast %cst_41 : f32 to vector<32x1xf32>
    %117 = arith.addf %113, %116 : vector<32x1xf32>
    %118 = math.rsqrt %117 : vector<32x1xf32>
    %119 = vector.broadcast %118 : vector<32x1xf32> to vector<32x32xf32>
    %120 = arith.mulf %115, %119 : vector<32x32xf32>
    %121 = vector.broadcast %18 : vector<1x32xf32> to vector<32x32xf32>
    %122 = arith.mulf %120, %121 : vector<32x32xf32>
    %123 = vector.broadcast %19 : vector<1x32xf32> to vector<32x32xf32>
    %124 = arith.addf %122, %123 : vector<32x32xf32>
    %c0_42 = arith.constant 0 : index
    %c0_43 = arith.constant 0 : index
    %c0_44 = arith.constant 0 : index
    %125 = vector.load %arg8[%c0_42, %c0_43, %c0_44] : memref<2x32x64xf32, #tpu.memory_space<vmem>>, vector<1x32x64xf32>
    %126 = vector.shape_cast %125 : vector<1x32x64xf32> to vector<32x64xf32>
    %cst_45 = arith.constant dense<0.000000e+00> : vector<32x64xf32>
    %127 = tpu.matmul %124, %126, %cst_45 {dimension_numbers = #tpu.dot_dimension_numbers<[1], [0], [0], [1], [0, 0, 1, 1], [], []>} : vector<32x32xf32>, vector<32x64xf32>, vector<32x64xf32> -> vector<32x64xf32>
    %128 = vector.broadcast %22 : vector<1x64xf32> to vector<32x64xf32>
    %129 = arith.addf %127, %128 : vector<32x64xf32>
    %cst_46 = arith.constant 0.000000e+00 : f32
    %130 = vector.broadcast %cst_46 : f32 to vector<32x64xf32>
    %131 = arith.maximumf %129, %130 : vector<32x64xf32>
    %c0_47 = arith.constant 0 : index
    %c0_48 = arith.constant 0 : index
    %c0_49 = arith.constant 0 : index
    %132 = vector.load %arg9[%c0_47, %c0_48, %c0_49] : memref<2x64x32xf32, #tpu.memory_space<vmem>>, vector<1x64x32xf32>
    %133 = vector.shape_cast %132 : vector<1x64x32xf32> to vector<64x32xf32>
    %cst_50 = arith.constant dense<0.000000e+00> : vector<32x32xf32>
    %134 = tpu.matmul %131, %133, %cst_50 {dimension_numbers = #tpu.dot_dimension_numbers<[1], [0], [0], [1], [0, 0, 1, 1], [], []>} : vector<32x64xf32>, vector<64x32xf32>, vector<32x32xf32> -> vector<32x32xf32>
    %135 = arith.addf %100, %134 : vector<32x32xf32>
    %136 = vector.broadcast %21 : vector<1x32xf32> to vector<32x32xf32>
    %137 = arith.addf %135, %136 : vector<32x32xf32>
    %c1 = arith.constant 1 : index
    %c0_51 = arith.constant 0 : index
    %c0_52 = arith.constant 0 : index
    %138 = vector.load %arg10[%c1, %c0_51, %c0_52] : memref<2x8x64xf32, #tpu.memory_space<vmem>>, vector<1x8x64xf32>
    %139 = vector.shape_cast %138 : vector<1x8x64xf32> to vector<8x64xf32>
    %140 = vector.extract_strided_slice %139 {offsets = [0, 0], sizes = [1, 32], strides = [1, 1]} : vector<8x64xf32> to vector<1x32xf32>
    %141 = vector.extract_strided_slice %139 {offsets = [1, 0], sizes = [1, 32], strides = [1, 1]} : vector<8x64xf32> to vector<1x32xf32>
    %142 = vector.extract_strided_slice %139 {offsets = [2, 0], sizes = [1, 32], strides = [1, 1]} : vector<8x64xf32> to vector<1x32xf32>
    %143 = vector.extract_strided_slice %139 {offsets = [3, 0], sizes = [1, 32], strides = [1, 1]} : vector<8x64xf32> to vector<1x32xf32>
    %144 = vector.extract_strided_slice %139 {offsets = [4, 0], sizes = [1, 32], strides = [1, 1]} : vector<8x64xf32> to vector<1x32xf32>
    %145 = vector.extract_strided_slice %139 {offsets = [5, 0], sizes = [1, 32], strides = [1, 1]} : vector<8x64xf32> to vector<1x32xf32>
    %146 = vector.extract_strided_slice %139 {offsets = [6, 0], sizes = [1, 64], strides = [1, 1]} : vector<8x64xf32> to vector<1x64xf32>
    %cst_53 = arith.constant dense<0.000000e+00> : vector<32xf32>
    %147 = vector.multi_reduction <add>, %137, %cst_53 [1] : vector<32x32xf32> to vector<32xf32>
    %148 = vector.shape_cast %147 : vector<32xf32> to vector<32x1xf32>
    %cst_54 = arith.constant 3.200000e+01 : f32
    %149 = vector.broadcast %cst_54 : f32 to vector<32x1xf32>
    %150 = arith.divf %148, %149 : vector<32x1xf32>
    %151 = vector.broadcast %150 : vector<32x1xf32> to vector<32x32xf32>
    %152 = arith.subf %137, %151 : vector<32x32xf32>
    %153 = vector.broadcast %150 : vector<32x1xf32> to vector<32x32xf32>
    %154 = arith.subf %137, %153 : vector<32x32xf32>
    %155 = arith.mulf %152, %154 : vector<32x32xf32>
    %cst_55 = arith.constant dense<0.000000e+00> : vector<32xf32>
    %156 = vector.multi_reduction <add>, %155, %cst_55 [1] : vector<32x32xf32> to vector<32xf32>
    %157 = vector.shape_cast %156 : vector<32xf32> to vector<32x1xf32>
    %cst_56 = arith.constant 3.200000e+01 : f32
    %158 = vector.broadcast %cst_56 : f32 to vector<32x1xf32>
    %159 = arith.divf %157, %158 : vector<32x1xf32>
    %160 = vector.broadcast %150 : vector<32x1xf32> to vector<32x32xf32>
    %161 = arith.subf %137, %160 : vector<32x32xf32>
    %cst_57 = arith.constant 9.99999974E-6 : f32
    %162 = vector.broadcast %cst_57 : f32 to vector<32x1xf32>
    %163 = arith.addf %159, %162 : vector<32x1xf32>
    %164 = math.rsqrt %163 : vector<32x1xf32>
    %165 = vector.broadcast %164 : vector<32x1xf32> to vector<32x32xf32>
    %166 = arith.mulf %161, %165 : vector<32x32xf32>
    %167 = vector.broadcast %140 : vector<1x32xf32> to vector<32x32xf32>
    %168 = arith.mulf %166, %167 : vector<32x32xf32>
    %169 = vector.broadcast %141 : vector<1x32xf32> to vector<32x32xf32>
    %170 = arith.addf %168, %169 : vector<32x32xf32>
    %c1_58 = arith.constant 1 : index
    %c0_59 = arith.constant 0 : index
    %c0_60 = arith.constant 0 : index
    %171 = vector.load %arg5[%c1_58, %c0_59, %c0_60] : memref<2x32x192xf32, #tpu.memory_space<vmem>>, vector<1x32x192xf32>
    %172 = vector.shape_cast %171 : vector<1x32x192xf32> to vector<32x192xf32>
    %cst_61 = arith.constant dense<0.000000e+00> : vector<32x192xf32>
    %173 = tpu.matmul %170, %172, %cst_61 {dimension_numbers = #tpu.dot_dimension_numbers<[1], [0], [0], [1], [0, 0, 1, 1], [], []>} : vector<32x32xf32>, vector<32x192xf32>, vector<32x192xf32> -> vector<32x192xf32>
    %c1_62 = arith.constant 1 : index
    %c0_63 = arith.constant 0 : index
    %c0_64 = arith.constant 0 : index
    %174 = vector.load %arg6[%c1_62, %c0_63, %c0_64] : memref<2x1x192xf32, #tpu.memory_space<vmem>>, vector<1x1x192xf32>
    %175 = vector.shape_cast %174 : vector<1x1x192xf32> to vector<1x192xf32>
    %176 = vector.broadcast %175 : vector<1x192xf32> to vector<32x192xf32>
    %177 = arith.addf %173, %176 : vector<32x192xf32>
    %178 = vector.extract_strided_slice %177 {offsets = [0, 0], sizes = [32, 32], strides = [1, 1]} : vector<32x192xf32> to vector<32x32xf32>
    %179 = vector.shape_cast %178 : vector<32x32xf32> to vector<2x16x32xf32>
    %180 = vector.extract_strided_slice %177 {offsets = [0, 64], sizes = [32, 32], strides = [1, 1]} : vector<32x192xf32> to vector<32x32xf32>
    %181 = vector.shape_cast %180 : vector<32x32xf32> to vector<2x16x32xf32>
    %182 = vector.extract_strided_slice %177 {offsets = [0, 128], sizes = [32, 32], strides = [1, 1]} : vector<32x192xf32> to vector<32x32xf32>
    %183 = vector.shape_cast %182 : vector<32x32xf32> to vector<2x16x32xf32>
    "tpu.trace_start"() <{level = 10 : i32, message = "bqd,bkd->bqk"}> : () -> ()
    %cst_65 = arith.constant dense<0.000000e+00> : vector<2x16x16xf32>
    %184 = tpu.matmul %179, %181, %cst_65 {dimension_numbers = #tpu.dot_dimension_numbers<[2], [2], [1], [1], [0, 0, 0, 1, 1, 1], [0], [0]>} : vector<2x16x32xf32>, vector<2x16x32xf32>, vector<2x16x16xf32> -> vector<2x16x16xf32>
    "tpu.trace_stop"() : () -> ()
    %cst_66 = arith.constant 2.500000e-01 : f32
    %185 = vector.broadcast %cst_66 : f32 to vector<2x16x16xf32>
    %186 = arith.mulf %184, %185 : vector<2x16x16xf32>
    %cst_67 = arith.constant dense<0xFF800000> : vector<2x16xf32>
    %187 = vector.multi_reduction <maximumf>, %186, %cst_67 [2] : vector<2x16x16xf32> to vector<2x16xf32>
    %188 = vector.shape_cast %187 : vector<2x16xf32> to vector<2x16x1xf32>
    %189 = vector.broadcast %188 : vector<2x16x1xf32> to vector<2x16x16xf32>
    %190 = arith.subf %186, %189 : vector<2x16x16xf32>
    %191 = math.exp %190 : vector<2x16x16xf32>
    %cst_68 = arith.constant dense<0.000000e+00> : vector<2x16xf32>
    %192 = vector.multi_reduction <add>, %191, %cst_68 [2] : vector<2x16x16xf32> to vector<2x16xf32>
    %193 = vector.shape_cast %192 : vector<2x16xf32> to vector<2x16x1xf32>
    %194 = vector.broadcast %193 : vector<2x16x1xf32> to vector<2x16x16xf32>
    %195 = arith.divf %191, %194 : vector<2x16x16xf32>
    "tpu.trace_start"() <{level = 10 : i32, message = "bqk,bkd->bqd"}> : () -> ()
    %cst_69 = arith.constant dense<0.000000e+00> : vector<2x16x32xf32>
    %196 = tpu.matmul %195, %183, %cst_69 {dimension_numbers = #tpu.dot_dimension_numbers<[2], [1], [1], [2], [0, 0, 0, 1, 1, 2], [0], [0]>} : vector<2x16x16xf32>, vector<2x16x32xf32>, vector<2x16x32xf32> -> vector<2x16x32xf32>
    "tpu.trace_stop"() : () -> ()
    %197 = vector.shape_cast %196 : vector<2x16x32xf32> to vector<32x32xf32>
    %198 = vector.extract_strided_slice %177 {offsets = [0, 32], sizes = [32, 32], strides = [1, 1]} : vector<32x192xf32> to vector<32x32xf32>
    %199 = vector.shape_cast %198 : vector<32x32xf32> to vector<2x16x32xf32>
    %200 = vector.extract_strided_slice %177 {offsets = [0, 96], sizes = [32, 32], strides = [1, 1]} : vector<32x192xf32> to vector<32x32xf32>
    %201 = vector.shape_cast %200 : vector<32x32xf32> to vector<2x16x32xf32>
    %202 = vector.extract_strided_slice %177 {offsets = [0, 160], sizes = [32, 32], strides = [1, 1]} : vector<32x192xf32> to vector<32x32xf32>
    %203 = vector.shape_cast %202 : vector<32x32xf32> to vector<2x16x32xf32>
    "tpu.trace_start"() <{level = 10 : i32, message = "bqd,bkd->bqk"}> : () -> ()
    %cst_70 = arith.constant dense<0.000000e+00> : vector<2x16x16xf32>
    %204 = tpu.matmul %199, %201, %cst_70 {dimension_numbers = #tpu.dot_dimension_numbers<[2], [2], [1], [1], [0, 0, 0, 1, 1, 1], [0], [0]>} : vector<2x16x32xf32>, vector<2x16x32xf32>, vector<2x16x16xf32> -> vector<2x16x16xf32>
    "tpu.trace_stop"() : () -> ()
    %cst_71 = arith.constant 2.500000e-01 : f32
    %205 = vector.broadcast %cst_71 : f32 to vector<2x16x16xf32>
    %206 = arith.mulf %204, %205 : vector<2x16x16xf32>
    %cst_72 = arith.constant dense<0xFF800000> : vector<2x16xf32>
    %207 = vector.multi_reduction <maximumf>, %206, %cst_72 [2] : vector<2x16x16xf32> to vector<2x16xf32>
    %208 = vector.shape_cast %207 : vector<2x16xf32> to vector<2x16x1xf32>
    %209 = vector.broadcast %208 : vector<2x16x1xf32> to vector<2x16x16xf32>
    %210 = arith.subf %206, %209 : vector<2x16x16xf32>
    %211 = math.exp %210 : vector<2x16x16xf32>
    %cst_73 = arith.constant dense<0.000000e+00> : vector<2x16xf32>
    %212 = vector.multi_reduction <add>, %211, %cst_73 [2] : vector<2x16x16xf32> to vector<2x16xf32>
    %213 = vector.shape_cast %212 : vector<2x16xf32> to vector<2x16x1xf32>
    %214 = vector.broadcast %213 : vector<2x16x1xf32> to vector<2x16x16xf32>
    %215 = arith.divf %211, %214 : vector<2x16x16xf32>
    "tpu.trace_start"() <{level = 10 : i32, message = "bqk,bkd->bqd"}> : () -> ()
    %cst_74 = arith.constant dense<0.000000e+00> : vector<2x16x32xf32>
    %216 = tpu.matmul %215, %203, %cst_74 {dimension_numbers = #tpu.dot_dimension_numbers<[2], [1], [1], [2], [0, 0, 0, 1, 1, 2], [0], [0]>} : vector<2x16x16xf32>, vector<2x16x32xf32>, vector<2x16x32xf32> -> vector<2x16x32xf32>
    "tpu.trace_stop"() : () -> ()
    %217 = vector.shape_cast %216 : vector<2x16x32xf32> to vector<32x32xf32>
    %218 = tpu.concatenate %197, %217 in 1 : vector<32x32xf32>, vector<32x32xf32> -> vector<32x64xf32>
    %c1_75 = arith.constant 1 : index
    %c0_76 = arith.constant 0 : index
    %c0_77 = arith.constant 0 : index
    %219 = vector.load %arg7[%c1_75, %c0_76, %c0_77] : memref<2x64x32xf32, #tpu.memory_space<vmem>>, vector<1x64x32xf32>
    %220 = vector.shape_cast %219 : vector<1x64x32xf32> to vector<64x32xf32>
    %cst_78 = arith.constant dense<0.000000e+00> : vector<32x32xf32>
    %221 = tpu.matmul %218, %220, %cst_78 {dimension_numbers = #tpu.dot_dimension_numbers<[1], [0], [0], [1], [0, 0, 1, 1], [], []>} : vector<32x64xf32>, vector<64x32xf32>, vector<32x32xf32> -> vector<32x32xf32>
    %222 = vector.broadcast %144 : vector<1x32xf32> to vector<32x32xf32>
    %223 = arith.addf %221, %222 : vector<32x32xf32>
    %224 = arith.addf %137, %223 : vector<32x32xf32>
    %cst_79 = arith.constant dense<0.000000e+00> : vector<32xf32>
    %225 = vector.multi_reduction <add>, %224, %cst_79 [1] : vector<32x32xf32> to vector<32xf32>
    %226 = vector.shape_cast %225 : vector<32xf32> to vector<32x1xf32>
    %cst_80 = arith.constant 3.200000e+01 : f32
    %227 = vector.broadcast %cst_80 : f32 to vector<32x1xf32>
    %228 = arith.divf %226, %227 : vector<32x1xf32>
    %229 = vector.broadcast %228 : vector<32x1xf32> to vector<32x32xf32>
    %230 = arith.subf %224, %229 : vector<32x32xf32>
    %231 = vector.broadcast %228 : vector<32x1xf32> to vector<32x32xf32>
    %232 = arith.subf %224, %231 : vector<32x32xf32>
    %233 = arith.mulf %230, %232 : vector<32x32xf32>
    %cst_81 = arith.constant dense<0.000000e+00> : vector<32xf32>
    %234 = vector.multi_reduction <add>, %233, %cst_81 [1] : vector<32x32xf32> to vector<32xf32>
    %235 = vector.shape_cast %234 : vector<32xf32> to vector<32x1xf32>
    %cst_82 = arith.constant 3.200000e+01 : f32
    %236 = vector.broadcast %cst_82 : f32 to vector<32x1xf32>
    %237 = arith.divf %235, %236 : vector<32x1xf32>
    %238 = vector.broadcast %228 : vector<32x1xf32> to vector<32x32xf32>
    %239 = arith.subf %224, %238 : vector<32x32xf32>
    %cst_83 = arith.constant 9.99999974E-6 : f32
    %240 = vector.broadcast %cst_83 : f32 to vector<32x1xf32>
    %241 = arith.addf %237, %240 : vector<32x1xf32>
    %242 = math.rsqrt %241 : vector<32x1xf32>
    %243 = vector.broadcast %242 : vector<32x1xf32> to vector<32x32xf32>
    %244 = arith.mulf %239, %243 : vector<32x32xf32>
    %245 = vector.broadcast %142 : vector<1x32xf32> to vector<32x32xf32>
    %246 = arith.mulf %244, %245 : vector<32x32xf32>
    %247 = vector.broadcast %143 : vector<1x32xf32> to vector<32x32xf32>
    %248 = arith.addf %246, %247 : vector<32x32xf32>
    %c1_84 = arith.constant 1 : index
    %c0_85 = arith.constant 0 : index
    %c0_86 = arith.constant 0 : index
    %249 = vector.load %arg8[%c1_84, %c0_85, %c0_86] : memref<2x32x64xf32, #tpu.memory_space<vmem>>, vector<1x32x64xf32>
    %250 = vector.shape_cast %249 : vector<1x32x64xf32> to vector<32x64xf32>
    %cst_87 = arith.constant dense<0.000000e+00> : vector<32x64xf32>
    %251 = tpu.matmul %248, %250, %cst_87 {dimension_numbers = #tpu.dot_dimension_numbers<[1], [0], [0], [1], [0, 0, 1, 1], [], []>} : vector<32x32xf32>, vector<32x64xf32>, vector<32x64xf32> -> vector<32x64xf32>
    %252 = vector.broadcast %146 : vector<1x64xf32> to vector<32x64xf32>
    %253 = arith.addf %251, %252 : vector<32x64xf32>
    %cst_88 = arith.constant 0.000000e+00 : f32
    %254 = vector.broadcast %cst_88 : f32 to vector<32x64xf32>
    %255 = arith.maximumf %253, %254 : vector<32x64xf32>
    %c1_89 = arith.constant 1 : index
    %c0_90 = arith.constant 0 : index
    %c0_91 = arith.constant 0 : index
    %256 = vector.load %arg9[%c1_89, %c0_90, %c0_91] : memref<2x64x32xf32, #tpu.memory_space<vmem>>, vector<1x64x32xf32>
    %257 = vector.shape_cast %256 : vector<1x64x32xf32> to vector<64x32xf32>
    %cst_92 = arith.constant dense<0.000000e+00> : vector<32x32xf32>
    %258 = tpu.matmul %255, %257, %cst_92 {dimension_numbers = #tpu.dot_dimension_numbers<[1], [0], [0], [1], [0, 0, 1, 1], [], []>} : vector<32x64xf32>, vector<64x32xf32>, vector<32x32xf32> -> vector<32x32xf32>
    %259 = arith.addf %224, %258 : vector<32x32xf32>
    %260 = vector.broadcast %145 : vector<1x32xf32> to vector<32x32xf32>
    %261 = arith.addf %259, %260 : vector<32x32xf32>
    %262 = vector.shape_cast %261 : vector<32x32xf32> to vector<2x16x32xf32>
    %c0_93 = arith.constant 0 : index
    %c0_94 = arith.constant 0 : index
    %c0_95 = arith.constant 0 : index
    %263 = vector.load %arg11[%c0_93, %c0_94, %c0_95] : memref<2x16x32xf32, #tpu.memory_space<vmem>>, vector<2x16x32xf32>
    tpu.vector_store %arg11[%c0_93, %c0_94, %c0_95], %262 {strides = array<i32>} : memref<2x16x32xf32, #tpu.memory_space<vmem>>, vector<2x16x32xf32>,
    return
  }
  func.func @transform_0(%arg0: i32) -> (i32, i32, i32) {
    %c0_i32 = arith.constant 0 : i32
    %c0_i32_0 = arith.constant 0 : i32
    %c0_i32_1 = arith.constant 0 : i32
    return %arg0, %c0_i32, %c0_i32_0 : i32, i32, i32
  }
  func.func @transform_1(%arg0: i32) -> (i32, i32) {
    %c0_i32 = arith.constant 0 : i32
    %c0_i32_0 = arith.constant 0 : i32
    %c0_i32_1 = arith.constant 0 : i32
    return %c0_i32, %c0_i32_0 : i32, i32
  }
  func.func @transform_2(%arg0: i32) -> (i32, i32) {
    %c0_i32 = arith.constant 0 : i32
    %c0_i32_0 = arith.constant 0 : i32
    %c0_i32_1 = arith.constant 0 : i32
    return %c0_i32, %c0_i32_0 : i32, i32
  }
  func.func @transform_3(%arg0: i32) -> (i32, i32) {
    %c0_i32 = arith.constant 0 : i32
    %c0_i32_0 = arith.constant 0 : i32
    %c0_i32_1 = arith.constant 0 : i32
    return %c0_i32, %c0_i32_0 : i32, i32
  }
  func.func @transform_4(%arg0: i32) -> (i32, i32, i32) {
    %c0_i32 = arith.constant 0 : i32
    %c0_i32_0 = arith.constant 0 : i32
    %c0_i32_1 = arith.constant 0 : i32
    %c0_i32_2 = arith.constant 0 : i32
    return %c0_i32, %c0_i32_0, %c0_i32_1 : i32, i32, i32
  }
  func.func @transform_5(%arg0: i32) -> (i32, i32, i32) {
    %c0_i32 = arith.constant 0 : i32
    %c0_i32_0 = arith.constant 0 : i32
    %c0_i32_1 = arith.constant 0 : i32
    %c0_i32_2 = arith.constant 0 : i32
    return %c0_i32, %c0_i32_0, %c0_i32_1 : i32, i32, i32
  }
  func.func @transform_6(%arg0: i32) -> (i32, i32, i32) {
    %c0_i32 = arith.constant 0 : i32
    %c0_i32_0 = arith.constant 0 : i32
    %c0_i32_1 = arith.constant 0 : i32
    %c0_i32_2 = arith.constant 0 : i32
    return %c0_i32, %c0_i32_0, %c0_i32_1 : i32, i32, i32
  }
  func.func @transform_7(%arg0: i32) -> (i32, i32, i32) {
    %c0_i32 = arith.constant 0 : i32
    %c0_i32_0 = arith.constant 0 : i32
    %c0_i32_1 = arith.constant 0 : i32
    %c0_i32_2 = arith.constant 0 : i32
    return %c0_i32, %c0_i32_0, %c0_i32_1 : i32, i32, i32
  }
  func.func @transform_8(%arg0: i32) -> (i32, i32, i32) {
    %c0_i32 = arith.constant 0 : i32
    %c0_i32_0 = arith.constant 0 : i32
    %c0_i32_1 = arith.constant 0 : i32
    %c0_i32_2 = arith.constant 0 : i32
    return %c0_i32, %c0_i32_0, %c0_i32_1 : i32, i32, i32
  }
  func.func @transform_9(%arg0: i32) -> (i32, i32, i32) {
    %c0_i32 = arith.constant 0 : i32
    %c0_i32_0 = arith.constant 0 : i32
    %c0_i32_1 = arith.constant 0 : i32
    %c0_i32_2 = arith.constant 0 : i32
    return %c0_i32, %c0_i32_0, %c0_i32_1 : i32, i32, i32
  }
  func.func @transform_10(%arg0: i32) -> (i32, i32, i32) {
    %c0_i32 = arith.constant 0 : i32
    %c0_i32_0 = arith.constant 0 : i32
    %c0_i32_1 = arith.constant 0 : i32
    return %arg0, %c0_i32, %c0_i32_0 : i32, i32, i32
  }
}

</mosaic_0001>

<bundles_post_ra>
// kernel: tpu_custom_call.1
= control target key start
LH: loop header
LB: loop body
LE: loop exit
PB: predicated region body
PF: predicated region fallthrough
CT: control target
= control target key end

     0   :  { %vm48_vm0 = vcmask 523264   ;;  %s4710_s0 = inlined_call_operand.vmem [shape: f32[2,16,64], index: 0, kind: input, shape index: {}]   ;;  %s4711_s1 = inlined_call_operand.vmem [shape: f32[16,32], index: 1, kind: input, shape index: {}]   ;;  %s4712_s2 = inlined_call_operand.vmem [shape: f32[1,32], index: 2, kind: input, shape index: {}]   ;;  %s4713_s3 = inlined_call_operand.vmem [shape: f32[64,32], index: 3, kind: input, shape index: {}]   ;;  %s4714_s4 = inlined_call_operand.vmem [shape: f32[2,32,192], index: 4, kind: input, shape index: {}]   ;;  %s4715_s5 = inlined_call_operand.vmem [shape: f32[2,1,192], index: 5, kind: input, shape index: {}]   ;;  %s4716_s6 = inlined_call_operand.vmem [shape: f32[2,64,32], index: 6, kind: input, shape index: {}]   ;;  %s4717_s7 = inlined_call_operand.vmem [shape: f32[2,32,64], index: 7, kind: input, shape index: {}]   ;;  %s4718_s8 = inlined_call_operand.vmem [shape: f32[2,64,32], index: 8, kind: input, shape index: {}]   ;;  %s4719_s9 = inlined_call_operand.vmem [shape: f32[2,8,64], index: 9, kind: input, shape index: {}]   ;;  %s4720_s10 = inlined_call_operand.hbm [shape: f32[2,16,32], index: 10, kind: output, shape index: {}]  }
   0x1   :  { %v40_v0 = vld [vmem:[%s4713_s3] sm:$0xff]  ;;  %v41_v1 = vld [vmem:[%s4713_s3 + $0x8] sm:$0xff]  ;;  %v42_v2 = vld [vmem:[%s4713_s3 + $0x10] sm:$0xff] }
   0x2   :  { %v3523_v3 = vpack.c.bf16 %v41_v1, %v40_v0  ;;  %v43_v4 = vld [vmem:[%s4713_s3 + $0x18] sm:$0xff]  ;;  %v44_v6 = vld [vmem:[%s4713_s3 + $0x20] sm:$0xff]  ;;  %v45_v7 = vld [vmem:[%s4713_s3 + $0x28] sm:$0xff] }
   0x3   :  { %v3527_v5 = vpack.c.bf16 %v43_v4, %v42_v2  ;;  %v36_v8 = vld [vmem:[%s4710_s0] sm:$0xff] }
   0x4   :  { %3524 = vmatprep.subr.bf16.mxu0 %v3523_v3  ;;  %3289 = vmatprep.mubr.msk.f32.mxu0 %vm48_vm0, %v36_v8 }
   0x5   :  { %3526 = vmatpush3.bf16.msra.mxu0 %v3523_v3 }
   0x6   :  { %15 = vsyncpa [#allocation3], 0  ;;  %3528 = vmatprep.subr.bf16.mxu0 %v3527_v5  ;;  %v3531_v9 = vpack.c.bf16 %v45_v7, %v44_v6  ;;  %v46_v10 = vld [vmem:[%s4713_s3 + $0x30] sm:$0xff]  ;;  %v47_v11 = vld [vmem:[%s4713_s3 + $0x38] sm:$0xff]  ;;  %vm164_vm1 = vcmask 261120   ;;  %v3902_v1 = vmov 0.0   ;;  %v218_v6 = vlaneseq }
   0x7   :  { %v3535_v12 = vpack.c.bf16 %v47_v11, %v46_v10  ;;  %v37_v13 = vld [vmem:[%s4710_s0 + $0x8] sm:$0xff]  ;;  %v38_v14 = vld [vmem:[%s4710_s0 + $0x10] sm:$0xff]  ;;  %v39_v15 = vld [vmem:[%s4710_s0 + $0x18] sm:$0xff]  ;;  %330 = vmatprep.mubr.f32.mxu1 %v3902_v1  ;;  %s3903_s18 = smov 64   ;;  %vm537_vm3 = vcmask 130048   ;;  %s3904_s19 = smov 96  }
   0x8   :  { %v147_v16 = vld [vmem:[%s4711_s1 + $0x8] sm:$0xff]  ;;  %v146_v17 = vld [vmem:[%s4711_s1] sm:$0xff]  ;;  %v237_v56 = vld [vmem:[%s4714_s4 + $0x18] sm:$0xff]  ;;  %s3905_s20 = smov 32  }
   0x9   :  { %3530 = vmatpush3.bf16.msra.mxu0 %v3527_v5  ;;  %v3022_v19 = vld [vmem:[%s4712_s2] ss:$0 sm:$0xff]  ;;  %v235_v55 = vld [vmem:[%s4714_s4 + $0x8] sm:$0xff]  ;;  %v236_v59 = vld [vmem:[%s4714_s4 + $0x10] sm:$0xff] }
   0xa   :  { %3532 = vmatprep.subr.bf16.mxu0 %v3531_v9  ;;  %v3539_v57 = vpack.c.bf16 %v237_v56, %v235_v55  ;;  %v234_v58 = vld [vmem:[%s4714_s4] sm:$0xff]  ;;  %v239_v60 = vld [vmem:[%s4714_s4 + $0x28] sm:$0xff]  ;;  %v241_v62 = vld [vmem:[%s4714_s4 + $0x38] sm:$0xff] }
   0xb   :  { %v3541_v61 = vpack.c.bf16 %v236_v59, %v234_v58  ;;  %v238_v63 = vld [vmem:[%s4714_s4 + $0x20] sm:$0xff]  ;;  %v240_v0 = vld [vmem:[%s4714_s4 + $0x30] sm:$0xff]  ;;  %v3543_v2 = vpack.c.bf16 %v241_v62, %v239_v60  ;;  %vm4155_vm2 = vmpackc.low %vm164_vm1, %vm164_vm1 }
   0xc   :  { %3540 = vmatprep.subr.bf16.mxu1 %v3539_v57  ;;  %v3545_v3 = vpack.c.bf16 %v240_v0, %v238_v63 }
   0xd   :  { %3534 = vmatpush3.bf16.msra.mxu0 %v3531_v9  ;;  %3542 = vmatpush1.bf16.msra.mxu1 %v3541_v61 }
   0xe   :  { %3536 = vmatprep.subr.bf16.mxu0 %v3535_v12  ;;  %3544 = vmatprep.subr.bf16.mxu1 %v3543_v2 }
  0x11   :  { %3538 = vmatpush3.bf16.msra.mxu0 %v3535_v12  ;;  %3546 = vmatpush1.bf16.msra.mxu1 %v3545_v3  ;;  %v4078_v12 = vshrl.u32 %v218_v6, 7 }
  0x14   :  { %3290 = vmatmul.mubr.msk.f32.vlgmr.msra.gmra.mrb[0].mxu0 %vm48_vm0, %v37_v13 }
  0x15   :  { %3292 = vmatprep.mubr.msk.f32.mxu0 %vm48_vm0, %v38_v14 }
  0x18   :  { %3293 = vmatmul.mubr.msk.f32.gmra.mrb[2].mxu0 %vm48_vm0, %v39_v15 }
  0xe7   :  { %v3291_v18 = vpop.f32.mrb[0].mxu0 }
  0xe8   :  { %v127_v20 = vpop.f32.mrb[1].mxu0  ;;  %v149_v21 = vadd.f32 %v3291_v18, %v147_v16 }
  0xe9   :  { %v148_v22 = vadd.f32 %v146_v17, %v127_v20  ;;  %v4089_v20 = vsub.s32 1, %v4078_v12 }
  0xea   :  { %v4015_v27 = vadd.f32 %v3022_v19, %v149_v21 }
  0xeb   :  { %v4013_v23 = vadd.f32 %v3022_v19, %v148_v22  ;;  %v3294_v24 = vpop.f32.mrb[2].mxu0 }
  0xec   :  { %v151_v25 = vadd.f32 %v3294_v24, %v147_v16  ;;  %v137_v26 = vpop.f32.mrb[3].mxu0  ;;  %v168_v32 = vsel %vm164_vm1, %v4015_v27, 0.0 }
  0xed   :  { %v150_v28 = vadd.f32 %v146_v17, %v137_v26  ;;  %v165_v29 = vsel %vm164_vm1, %v4013_v23, 0.0  ;;  %v4081_v17 = vsub.s32 0, %v4078_v12 }
  0xee   :  { %166 = vadd.xlane.f32.xlu0 %v165_v29  ;;  %v4019_v30 = vadd.f32 %v3022_v19, %v151_v25 }
  0xef   :  { %v4021_v31 = vadd.f32 %v3022_v19, %v150_v28  ;;  %v4086_v19 = vld [vmem:[%s4719_s9] sm:$0xff] }
  0xf0   :  { %v174_v34 = vsel %vm164_vm1, %v4019_v30, 0.0  ;;  %v221_v21 = vrot.slane %v4086_v19, %v4081_v17  ;;  %v229_v25 = vrot.slane %v4086_v19, %v4089_v20 }
  0xf1   :  { %v171_v33 = vsel %vm164_vm1, %v4021_v31, 0.0 }
  0xf2   :  { %169 = vadd.xlane.f32.xlu0 %v168_v32  ;;  %172 = vadd.xlane.f32.xlu1 %v171_v33 }
  0xf6   :  { %175 = vadd.xlane.f32.xlu1 %v174_v34 }
 0x17b   :  { %v167_v35 = vpop.xlane.xlu0 %166 }
 0x17c   :  { %v178_v36 = vmul.f32 0.03125, %v167_v35 }
 0x17e   :  { %v4030_v37 = vsub.f32 %v4013_v23, %v178_v36 }
 0x17f   :  { %v170_v38 = vpop.xlane.xlu0 %169  ;;  %v173_v39 = vpop.xlane.xlu1 %172 }
 0x180   :  { %v179_v40 = vmul.f32 0.03125, %v170_v38  ;;  %v180_v41 = vmul.f32 0.03125, %v173_v39  ;;  %v186_v42 = vmul.f32 %v4030_v37, %v4030_v37 }
 0x182   :  { %v4035_v43 = vsub.f32 %v4015_v27, %v179_v40  ;;  %v4038_v44 = vsub.f32 %v4021_v31, %v180_v41  ;;  %v190_v45 = vsel %vm164_vm1, %v186_v42, 0.0 }
 0x183   :  { %191 = vadd.xlane.f32.xlu0 %v190_v45  ;;  %v176_v46 = vpop.xlane.xlu1 %175 }
 0x184   :  { %v181_v47 = vmul.f32 0.03125, %v176_v46  ;;  %v187_v48 = vmul.f32 %v4035_v43, %v4035_v43  ;;  %v188_v49 = vmul.f32 %v4038_v44, %v4038_v44 }
 0x186   :  { %v4046_v50 = vsub.f32 %v4019_v30, %v181_v47  ;;  %v193_v51 = vsel %vm164_vm1, %v187_v48, 0.0  ;;  %v196_v52 = vsel %vm164_vm1, %v188_v49, 0.0 }
 0x187   :  { %194 = vadd.xlane.f32.xlu1 %v193_v51  ;;  %197 = vadd.xlane.f32.xlu0 %v196_v52 }
 0x188   :  { %v189_v53 = vmul.f32 %v4046_v50, %v4046_v50 }
 0x18a   :  { %v199_v54 = vsel %vm164_vm1, %v189_v53, 0.0 }
 0x18b   :  { %200 = vadd.xlane.f32.xlu1 %v199_v54 }
 0x210   :  { %v192_v4 = vpop.xlane.xlu0 %191 }
 0x211   :  { %v202_v5 = vmul.f32 0.03125, %v192_v4 }
 0x213   :  { %v206_v7 = vadd.f32 1e-05, %v202_v5 }
 0x214   :  { %v198_v8 = vpop.xlane.xlu0 %197  ;;  %v195_v9 = vpop.xlane.xlu1 %194 }
 0x215   :  { %3782 = vrsqrt.f32 %v206_v7  ;;  %v204_v10 = vmul.f32 0.03125, %v198_v8  ;;  %v203_v11 = vmul.f32 0.03125, %v195_v9 }
 0x217   :  { %v208_v13 = vadd.f32 1e-05, %v204_v10  ;;  %v207_v14 = vadd.f32 1e-05, %v203_v11 }
 0x218   :  { %v201_v15 = vpop.xlane.xlu1 %200 }
 0x219   :  { %3784 = vrsqrt.f32 %v208_v13  ;;  %v205_v16 = vmul.f32 0.03125, %v201_v15 }
 0x21a   :  { %3786 = vrsqrt.f32 %v207_v14 }
 0x21b   :  { %v209_v18 = vadd.f32 1e-05, %v205_v16 }
 0x21d   :  { %3788 = vrsqrt.f32 %v209_v18 }
 0x21f   :  { %v3783_v22 = vpop.eup %3782 }
 0x220   :  { %v214_v24 = vmul.f32 %v3783_v22, %v4030_v37 }
 0x222   :  { %v222_v26 = vmul.f32 %v221_v21, %v214_v24 }
 0x223   :  { %v3785_v28 = vpop.eup %3784 }
 0x224   :  { %v3787_v29 = vpop.eup %3786  ;;  %v230_v32 = vadd.f32 %v229_v25, %v222_v26  ;;  %v216_v34 = vmul.f32 %v3785_v28, %v4038_v44 }
 0x225   :  { %v215_v33 = vmul.f32 %v3787_v29, %v4035_v43  ;;  %v242_v43 = vld [vmem:[%s4715_s5] sm:$0x3] }
 0x226   :  { %3023 = vmatmul.mubr.msk.f32.vlgmr.msra.gmra.mrb[0].mxu1 %vm164_vm1, %v230_v32  ;;  %v224_v39 = vmul.f32 %v221_v21, %v216_v34  ;;  %v247_v44 = vrot.slane %v242_v43, %v4081_v17  ;;  %v251_v48 = vrot.slane %v242_v43, %v4089_v20 }
 0x227   :  { %v3789_v35 = vpop.eup %3788  ;;  %336 = vmatprep.mubr.f32.mxu1 %v3902_v1  ;;  %v223_v36 = vmul.f32 %v221_v21, %v215_v33 }
 0x228   :  { %v217_v37 = vmul.f32 %v3789_v35, %v4046_v50  ;;  %v232_v40 = vadd.f32 %v229_v25, %v224_v39 }
 0x229   :  { %v231_v38 = vadd.f32 %v229_v25, %v223_v36 }
 0x22a   :  { %v225_v41 = vmul.f32 %v221_v21, %v217_v37 }
 0x22b   :  { %3024 = vmatmul.mubr.msk.f32.gmra.mrb[2].mxu1 %vm164_vm1, %v231_v38 }
 0x22c   :  { %342 = vmatprep.mubr.f32.mxu1 %v3902_v1  ;;  %v233_v42 = vadd.f32 %v229_v25, %v225_v41 }
 0x22f   :  { %3025 = vmatmul.mubr.msk.f32.gmra.mrb[4].mxu1 %vm164_vm1, %v232_v40 }
 0x230   :  { %348 = vmatprep.mubr.f32.mxu1 %v3902_v1 }
 0x233   :  { %3026 = vmatmul.mubr.msk.f32.gmra.mrb[6].mxu1 %vm164_vm1, %v233_v42 }
 0x2f9   :  { %v332_v45 = vpop.f32.mrb[0].mxu1 }
 0x2fa   :  { %v4110_v46 = vadd.f32 %v332_v45, %v247_v44  ;;  %v334_v47 = vpop.f32.mrb[1].mxu1 }
 0x2fb   :  { %v4117_v52 = vadd.f32 %v334_v47, %v251_v48 }
 0x2fc   :  { %3299 = vmatprep.mubr.msk.f32.mxu0 %vm164_vm1, %v4110_v46 }
 0x2fe   :  { %v338_v49 = vpop.f32.mrb[2].mxu1 }
 0x2ff   :  { %v4115_v50 = vadd.f32 %v338_v49, %v247_v44  ;;  %v340_v51 = vpop.f32.mrb[3].mxu1 }
 0x300   :  { %v4119_v53 = vadd.f32 %v340_v51, %v251_v48 }
 0x301   :  { %v4123_v54 = vpack.i.bf16 %v4115_v50, %v4110_v46 }
 0x302   :  { %v3742_v55 = vpack.i.bf16 %v4119_v53, %v4117_v52  ;;  %v3559_v56 = vpack.c.bf16 %v4119_v53, %v4117_v52  ;;  %v344_v57 = vpop.f32.mrb[4].mxu1 }
 0x303   :  { %v4129_v58 = vadd.f32 %v344_v57, %v247_v44  ;;  %v346_v59 = vpop.f32.mrb[5].mxu1  ;;  %3723 = vrot.lane.b32.xlu0 %v4123_v54, %s3903_s18 }
 0x304   :  { %v4137_v63 = vadd.f32 %v346_v59, %v251_v48 }
 0x305   :  { %3306 = vmatprep.mubr.msk.f32.mxu1 %vm164_vm1, %v4129_v58 }
 0x306   :  { %v350_v60 = vpop.f32.mrb[6].mxu1 }
 0x307   :  { %v4135_v61 = vadd.f32 %v350_v60, %v247_v44  ;;  %v352_v62 = vpop.f32.mrb[7].mxu1 }
 0x308   :  { %v4139_v0 = vadd.f32 %v352_v62, %v251_v48 }
 0x309   :  { %v4143_v2 = vpack.i.bf16 %v4135_v61, %v4129_v58 }
 0x30a   :  { %v3747_v3 = vpack.i.bf16 %v4139_v0, %v4137_v63  ;;  %v4149_v4 = vpack.c.bf16 %v4139_v0, %v4137_v63 }
 0x30b   :  { %3728 = vrot.lane.b32.xlu1 %v4143_v2, %s3903_s18 }
 0x375   :  { %v3724_v5 = vpop.permute.xlu0 %3723 }
 0x376   :  { %v3726_v6 = vunpack.i.h.bf16 %v3724_v5  ;;  %v3725_v7 = vunpack.i.l.bf16 %v3724_v5 }
 0x378   :  { %v3547_v9 = vpack.c.bf16 %v3726_v6, %v3725_v7 }
 0x37a   :  { %3549 = vmatprep.subr.msk.bf16.mxu0 %vm4155_vm2, %v3547_v9 }
 0x37b   :  { %3552 = vmatpush3.bf16.xpose.msk.msra.mxu0 %vm4155_vm2, %v3547_v9 }
 0x37c   :  { %3560 = vmatprep.subr.bf16.mxu0 %v3559_v56 }
 0x37d   :  { %v3729_v10 = vpop.permute.xlu1 %3728 }
 0x37e   :  { %v3731_v11 = vunpack.i.h.bf16 %v3729_v10  ;;  %v3730_v13 = vunpack.i.l.bf16 %v3729_v10 }
 0x380   :  { %v3553_v14 = vpack.c.bf16 %v3731_v11, %v3730_v13 }
 0x382   :  { %3300 = vmatmul.mubr.msk.f32.vlgmr.msra.gmra.mrb[4].mxu0 %vm164_vm1, %v4115_v50  ;;  %3555 = vmatprep.subr.msk.bf16.mxu1 %vm4155_vm2, %v3553_v14 }
 0x383   :  { %3558 = vmatpush3.bf16.xpose.msk.msra.mxu1 %vm4155_vm2, %v3553_v14  ;;  %3562 = vmatpush3.bf16.msra.mxu0 %v3559_v56 }
 0x384   :  { %3564 = vmatprep.subr.bf16.mxu0 %v4149_v4 }
 0x38a   :  { %3307 = vmatmul.mubr.msk.f32.vlgmr.msra.gmra.mrb[8].mxu1 %vm164_vm1, %v4135_v61 }
 0x455   :  { %v3301_v15 = vpop.f32.mrb[4].mxu0 }
 0x456   :  { %v534_v16 = vmul.f32 0.25, %v3301_v15  ;;  %v435_v18 = vpop.f32.mrb[5].mxu0 }
 0x457   :  { %v533_v21 = vmul.f32 0.25, %v435_v18 }
 0x458   :  { %v541_v22 = vsel %vm537_vm3, %v534_v16, -inf }
 0x459   :  { %542 = vmax.xlane.f32.xlu0 %v541_v22  ;;  %v538_v24 = vsel %vm537_vm3, %v533_v21, -inf }
 0x45a   :  { %539 = vmax.xlane.f32.xlu1 %v538_v24 }
 0x45d   :  { %v3308_v25 = vpop.f32.mrb[8].mxu1 }
 0x45e   :  { %v536_v26 = vmul.f32 0.25, %v3308_v25  ;;  %v524_v28 = vpop.f32.mrb[9].mxu1 }
 0x45f   :  { %v535_v29 = vmul.f32 0.25, %v524_v28 }
 0x460   :  { %v547_v32 = vsel %vm537_vm3, %v536_v26, -inf }
 0x461   :  { %548 = vmax.xlane.f32.xlu1 %v547_v32  ;;  %v544_v33 = vsel %vm537_vm3, %v535_v29, -inf }
 0x462   :  { %545 = vmax.xlane.f32.xlu0 %v544_v33 }
 0x4e6   :  { %v543_v34 = vpop.xlane.xlu0 %542 }
 0x4e7   :  { %v551_v35 = vsub.f32 %v534_v16, %v543_v34  ;;  %v540_v36 = vpop.xlane.xlu1 %539 }
 0x4e8   :  { %v550_v38 = vsub.f32 %v533_v21, %v540_v36 }
 0x4e9   :  { %v556_v39 = vmul.f32 1.442695, %v551_v35 }
 0x4ea   :  { %v554_v37 = vmul.f32 1.442695, %v550_v38 }
 0x4eb   :  { %3790 = vpow2.f32 %v556_v39 }
 0x4ec   :  { %3792 = vpow2.f32 %v554_v37 }
 0x4ee   :  { %v549_v40 = vpop.xlane.xlu1 %548 }
 0x4ef   :  { %v553_v41 = vsub.f32 %v536_v26, %v549_v40  ;;  %v546_v42 = vpop.xlane.xlu0 %545 }
 0x4f0   :  { %v552_v43 = vsub.f32 %v535_v29, %v546_v42 }
 0x4f1   :  { %v560_v44 = vmul.f32 1.442695, %v553_v41 }
 0x4f2   :  { %v558_v45 = vmul.f32 1.442695, %v552_v43 }
 0x4f3   :  { %3794 = vpow2.f32 %v560_v44 }
 0x4f4   :  { %3796 = vpow2.f32 %v558_v45 }
 0x4f5   :  { %v3791_v47 = vpop.eup %3790 }
 0x4f6   :  { %v3793_v48 = vpop.eup %3792  ;;  %v565_v49 = vsel %vm537_vm3, %v3791_v47, 0.0 }
 0x4f7   :  { %566 = vadd.xlane.f32.xlu1 %v565_v49  ;;  %v562_v51 = vsel %vm537_vm3, %v3793_v48, 0.0 }
 0x4f8   :  { %563 = vadd.xlane.f32.xlu0 %v562_v51 }
 0x4fd   :  { %v3795_v56 = vpop.eup %3794 }
 0x4fe   :  { %v3797_v57 = vpop.eup %3796  ;;  %v571_v59 = vsel %vm537_vm3, %v3795_v56, 0.0 }
 0x4ff   :  { %572 = vadd.xlane.f32.xlu1 %v571_v59  ;;  %v568_v60 = vsel %vm537_vm3, %v3797_v57, 0.0 }
 0x500   :  { %569 = vadd.xlane.f32.xlu0 %v568_v60 }
 0x510   :  { %744 = vrot.lane.b32.xlu1 %v4110_v46, %s3904_s19 }
 0x514   :  { %3738 = vrot.lane.b32.xlu1 %v4143_v2, %s3905_s20 }
 0x516   :  { %3733 = vrot.lane.b32.xlu0 %v4123_v54, %s3905_s20 }
 0x518   :  { %746 = vrot.lane.b32.xlu1 %v4115_v50, %s3904_s19 }
 0x51a   :  { %835 = vrot.lane.b32.xlu0 %v4129_v58, %s3904_s19 }
 0x51c   :  { %837 = vrot.lane.b32.xlu1 %v4135_v61, %s3904_s19 }
 0x584   :  { %v567_v62 = vpop.xlane.xlu1 %566 }
 0x585   :  { %3798 = vrcp.f32 %v567_v62  ;;  %v564_v5 = vpop.xlane.xlu0 %563 }
 0x586   :  { %3800 = vrcp.f32 %v564_v5 }
 0x58c   :  { %v573_v46 = vpop.xlane.xlu1 %572 }
 0x58d   :  { %3802 = vrcp.f32 %v573_v46  ;;  %v570_v6 = vpop.xlane.xlu0 %569 }
 0x58e   :  { %3804 = vrcp.f32 %v570_v6 }
 0x58f   :  { %v3799_v2 = vpop.eup %3798 }
 0x590   :  { %v3801_v7 = vpop.eup %3800  ;;  %v745_v54 = vpop.permute.xlu1 %744  ;;  %v577_v50 = vmul.f32 %v3799_v2, %v3791_v47 }
 0x591   :  { %v3734_v9 = vpop.permute.xlu0 %3733  ;;  %v575_v10 = vmul.f32 %v3801_v7, %v3793_v48 }
 0x592   :  { %v3736_v11 = vunpack.i.h.bf16 %v3734_v9  ;;  %v3735_v13 = vunpack.i.l.bf16 %v3734_v9 }
 0x593   :  { %3313 = vmatprep.mubr.msk.f32.mxu0 %vm537_vm3, %v575_v10 }
 0x594   :  { %v3567_v58 = vpack.c.bf16 %v3736_v11, %v3735_v13  ;;  %v3739_v61 = vpop.permute.xlu1 %3738  ;;  %3314 = vmatmul.mubr.msk.f32.vlgmr.msra.gmra.mrb[6].mxu0 %vm537_vm3, %v577_v50 }
 0x595   :  { %v3741_v14 = vunpack.i.h.bf16 %v3739_v61  ;;  %v3740_v15 = vunpack.i.l.bf16 %v3739_v61  ;;  %3566 = vmatpush3.bf16.msra.mxu0 %v4149_v4  ;;  %v836_v16 = vpop.permute.xlu0 %835 }
 0x596   :  { %3569 = vmatprep.subr.msk.bf16.mxu0 %vm4155_vm2, %v3567_v58  ;;  %3334 = vmatprep.mubr.msk.f32.mxu1 %vm164_vm1, %v836_v16 }
 0x597   :  { %v3803_v18 = vpop.eup %3802  ;;  %v3573_v21 = vpack.c.bf16 %v3741_v14, %v3740_v15 }
 0x598   :  { %v3805_v22 = vpop.eup %3804  ;;  %v581_v25 = vmul.f32 %v3803_v18, %v3795_v56  ;;  %v747_v26 = vpop.permute.xlu1 %746 }
 0x599   :  { %3575 = vmatprep.subr.msk.bf16.mxu1 %vm4155_vm2, %v3573_v21  ;;  %v579_v24 = vmul.f32 %v3805_v22, %v3797_v57 }
 0x59a   :  { %3578 = vmatpush3.bf16.xpose.msk.msra.mxu1 %vm4155_vm2, %v3573_v21 }
 0x59b   :  { %3320 = vmatprep.mubr.msk.f32.mxu0 %vm537_vm3, %v579_v24 }
 0x59c   :  { %3321 = vmatmul.mubr.msk.f32.vlgmr.msra.gmra.mrb[8].mxu0 %vm537_vm3, %v581_v25  ;;  %v838_v4 = vpop.permute.xlu1 %837 }
 0x59d   :  { %3327 = vmatprep.mubr.msk.f32.mxu0 %vm164_vm1, %v745_v54 }
 0x59e   :  { %3572 = vmatpush3.bf16.xpose.msk.msra.mxu0 %vm4155_vm2, %v3567_v58 }
 0x5a1   :  { %3335 = vmatmul.mubr.msk.f32.vlgmr.msra.gmra.mrb[10].mxu1 %vm164_vm1, %v838_v4 }
 0x5a5   :  { %3328 = vmatmul.mubr.msk.f32.vlgmr.msra.gmra.mrb[10].mxu0 %vm164_vm1, %v747_v26 }
 0x667   :  { %v4209_v28 = vpop.f32.mrb[6].mxu0 }
 0x668   :  { %v4211_v29 = vpop.f32.mrb[7].mxu0 }
 0x66f   :  { %v4213_v32 = vpop.f32.mrb[8].mxu0 }
 0x670   :  { %v4215_v33 = vpop.f32.mrb[9].mxu0 }
 0x674   :  { %v3336_v34 = vpop.f32.mrb[10].mxu1 }
 0x675   :  { %v917_v35 = vpop.f32.mrb[11].mxu1  ;;  %v929_v43 = vmul.f32 0.25, %v3336_v34 }
 0x676   :  { %v928_v41 = vmul.f32 0.25, %v917_v35 }
 0x677   :  { %v939_v45 = vsel %vm537_vm3, %v929_v43, -inf }
 0x678   :  { %v3329_v36 = vpop.f32.mrb[10].mxu0  ;;  %v936_v44 = vsel %vm537_vm3, %v928_v41, -inf }
 0x679   :  { %v927_v38 = vmul.f32 0.25, %v3329_v36  ;;  %v826_v39 = vpop.f32.mrb[11].mxu0  ;;  %v1172_v36 = vld [vmem:[%s4716_s6] sm:$0xff] }
 0x67a   :  { %v926_v37 = vmul.f32 0.25, %v826_v39  ;;  %v1174_v39 = vld [vmem:[%s4716_s6 + $0x10] sm:$0xff] }
 0x67b   :  { %v933_v40 = vsel %vm537_vm3, %v927_v38, -inf }
 0x67c   :  { %934 = vmax.xlane.f32.xlu1 %v933_v40  ;;  %v930_v42 = vsel %vm537_vm3, %v926_v37, -inf  ;;  %v1175_v40 = vld [vmem:[%s4716_s6 + $0x18] sm:$0xff] }
 0x67d   :  { %931 = vmax.xlane.f32.xlu0 %v930_v42  ;;  %v1176_v42 = vld [vmem:[%s4716_s6 + $0x20] sm:$0xff] }
 0x681   :  { %937 = vmax.xlane.f32.xlu0 %v936_v44 }
 0x685   :  { %940 = vmax.xlane.f32.xlu0 %v939_v45  ;;  %v1178_v45 = vld [vmem:[%s4716_s6 + $0x30] sm:$0xff] }
 0x709   :  { %v935_v49 = vpop.xlane.xlu1 %934 }
 0x70a   :  { %v932_v47 = vpop.xlane.xlu0 %931  ;;  %v943_v57 = vsub.f32 %v927_v38, %v935_v49  ;;  %v1173_v38 = vld [vmem:[%s4716_s6 + $0x8] sm:$0xff] }
 0x70b   :  { %v942_v48 = vsub.f32 %v926_v37, %v932_v47  ;;  %v3587_v37 = vpack.c.bf16 %v1173_v38, %v1172_v36  ;;  %v1179_v47 = vld [vmem:[%s4716_s6 + $0x38] sm:$0xff] }
 0x70c   :  { %v948_v46 = vmul.f32 1.442695, %v943_v57 }
 0x70d   :  { %v946_v59 = vmul.f32 1.442695, %v942_v48  ;;  %v3599_v48 = vpack.c.bf16 %v1179_v47, %v1178_v45  ;;  %v1462_v47 = vld [vmem:[%s4718_s8] sm:$0xff] }
 0x70e   :  { %v938_v51 = vpop.xlane.xlu0 %937 }
 0x70f   :  { %v944_v56 = vsub.f32 %v928_v41, %v938_v51  ;;  %v3591_v41 = vpack.c.bf16 %v1175_v40, %v1174_v39  ;;  %v1353_v40 = vld [vmem:[%s4717_s7] sm:$0xff] }
 0x711   :  { %v950_v60 = vmul.f32 1.442695, %v944_v56 }
 0x712   :  { %v941_v62 = vpop.xlane.xlu0 %940 }
 0x713   :  { %3806 = vpow2.f32 %v950_v60  ;;  %v945_v5 = vsub.f32 %v929_v43, %v941_v62  ;;  %v1177_v43 = vld [vmem:[%s4716_s6 + $0x28] sm:$0xff] }
 0x714   :  { %3808 = vpow2.f32 %v946_v59  ;;  %v3595_v44 = vpack.c.bf16 %v1177_v43, %v1176_v42  ;;  %v1355_v43 = vld [vmem:[%s4717_s7 + $0x10] sm:$0xff] }
 0x715   :  { %v952_v6 = vmul.f32 1.442695, %v945_v5 }
 0x717   :  { %3810 = vpow2.f32 %v952_v6 }
 0x718   :  { %3812 = vpow2.f32 %v948_v46 }
 0x71d   :  { %v3807_v2 = vpop.eup %3806 }
 0x71e   :  { %v960_v7 = vsel %vm537_vm3, %v3807_v2, 0.0  ;;  %v3809_v54 = vpop.eup %3808 }
 0x71f   :  { %961 = vadd.xlane.f32.xlu0 %v960_v7  ;;  %v954_v10 = vsel %vm537_vm3, %v3809_v54, 0.0 }
 0x721   :  { %v3811_v9 = vpop.eup %3810 }
 0x722   :  { %v963_v50 = vsel %vm537_vm3, %v3811_v9, 0.0  ;;  %v3813_v11 = vpop.eup %3812 }
 0x723   :  { %955 = vadd.xlane.f32.xlu0 %v954_v10  ;;  %964 = vadd.xlane.f32.xlu1 %v963_v50  ;;  %v957_v13 = vsel %vm537_vm3, %v3813_v11, 0.0 }
 0x727   :  { %958 = vadd.xlane.f32.xlu1 %v957_v13 }
 0x738   :  { %3748 = vrot.lane.b32.xlu1 %v3747_v3, %s3904_s19 }
 0x739   :  { %3743 = vrot.lane.b32.xlu0 %v3742_v55, %s3904_s19 }
 0x7ac   :  { %v962_v58 = vpop.xlane.xlu0 %961 }
 0x7ad   :  { %3814 = vrcp.f32 %v962_v58 }
 0x7b0   :  { %v965_v61 = vpop.xlane.xlu1 %964  ;;  %v956_v14 = vpop.xlane.xlu0 %955 }
 0x7b1   :  { %3816 = vrcp.f32 %v965_v61 }
 0x7b2   :  { %3818 = vrcp.f32 %v956_v14 }
 0x7b4   :  { %v959_v15 = vpop.xlane.xlu1 %958  ;;  %v3744_v16 = vpop.permute.xlu0 %3743 }
 0x7b5   :  { %3820 = vrcp.f32 %v959_v15  ;;  %v3746_v18 = vunpack.i.h.bf16 %v3744_v16  ;;  %v3745_v21 = vunpack.i.l.bf16 %v3744_v16 }
 0x7b7   :  { %v3815_v22 = vpop.eup %3814  ;;  %v3579_v24 = vpack.c.bf16 %v3746_v18, %v3745_v21 }
 0x7b8   :  { %v3749_v63 = vpop.permute.xlu1 %3748  ;;  %v971_v0 = vmul.f32 %v3815_v22, %v3807_v2 }
 0x7b9   :  { %v3751_v3 = vunpack.i.h.bf16 %v3749_v63  ;;  %v3750_v25 = vunpack.i.l.bf16 %v3749_v63  ;;  %3580 = vmatprep.subr.bf16.mxu0 %v3579_v24 }
 0x7ba   :  { %3582 = vmatpush3.bf16.msra.mxu0 %v3579_v24  ;;  %3348 = vmatprep.mubr.msk.f32.mxu1 %vm537_vm3, %v971_v0 }
 0x7bb   :  { %v3817_v52 = vpop.eup %3816  ;;  %v3583_v53 = vpack.c.bf16 %v3751_v3, %v3750_v25  ;;  %3588 = vmatprep.subr.bf16.mxu0 %v3587_v37 }
 0x7bc   :  { %v3819_v55 = vpop.eup %3818  ;;  %v973_v34 = vmul.f32 %v3817_v52, %v3811_v9 }
 0x7bd   :  { %3584 = vmatprep.subr.bf16.mxu1 %v3583_v53  ;;  %v967_v26 = vmul.f32 %v3819_v55, %v3809_v54 }
 0x7be   :  { %3586 = vmatpush3.bf16.msra.mxu1 %v3583_v53 }
 0x7bf   :  { %v3821_v4 = vpop.eup %3820  ;;  %3341 = vmatprep.mubr.msk.f32.mxu0 %vm537_vm3, %v967_v26 }
 0x7c0   :  { %v969_v35 = vmul.f32 %v3821_v4, %v3813_v11 }
 0x7c1   :  { %3349 = vmatmul.mubr.msk.f32.vlgmr.msra.gmra.mrb[12].mxu1 %vm537_vm3, %v973_v34 }
 0x7c2   :  { %3342 = vmatmul.mubr.msk.f32.vlgmr.msra.gmra.mrb[12].mxu0 %vm537_vm3, %v969_v35 }
 0x7c3   :  { %3590 = vmatpush3.bf16.msra.mxu0 %v3587_v37 }
 0x7c4   :  { %3592 = vmatprep.subr.bf16.mxu0 %v3591_v41 }
 0x7c7   :  { %3594 = vmatpush3.bf16.msra.mxu0 %v3591_v41  ;;  %v1354_v41 = vld [vmem:[%s4717_s7 + $0x8] sm:$0xff] }
 0x7c8   :  { %3596 = vmatprep.subr.bf16.mxu0 %v3595_v44  ;;  %v3603_v42 = vpack.c.bf16 %v1354_v41, %v1353_v40 }
 0x7ca   :  { %3604 = vmatprep.subr.bf16.mxu1 %v3603_v42 }
 0x7cb   :  { %3598 = vmatpush3.bf16.msra.mxu0 %v3595_v44  ;;  %v1356_v44 = vld [vmem:[%s4717_s7 + $0x18] sm:$0xff]  ;;  %3606 = vmatpush3.bf16.msra.mxu1 %v3603_v42 }
 0x7cc   :  { %3600 = vmatprep.subr.bf16.mxu0 %v3599_v48  ;;  %v3607_v45 = vpack.c.bf16 %v1356_v44, %v1355_v43 }
 0x7ce   :  { %3608 = vmatprep.subr.bf16.mxu1 %v3607_v45 }
 0x7cf   :  { %3602 = vmatpush3.bf16.msra.mxu0 %v3599_v48  ;;  %3610 = vmatpush3.bf16.msra.mxu1 %v3607_v45  ;;  %v1463_v48 = vld [vmem:[%s4718_s8 + $0x8] sm:$0xff] }
 0x894   :  { %v3350_v49 = vpop.f32.mrb[12].mxu1 }
 0x895   :  { %v3343_v51 = vpop.f32.mrb[12].mxu0  ;;  %v1143_v56 = vpop.f32.mrb[13].mxu1 }
 0x896   :  { %1160 = vrot.lane.b32.xlu0 %v1143_v56, %s3905_s20  ;;  %v1054_v57 = vpop.f32.mrb[13].mxu0 }
 0x897   :  { %1156 = vrot.lane.b32.xlu1 %v1054_v57, %s3905_s20 }
 0x89b   :  { %1158 = vrot.lane.b32.xlu1 %v3343_v51, %s3905_s20 }
 0x89f   :  { %1162 = vrot.lane.b32.xlu1 %v3350_v49, %s3905_s20  ;;  %v3611_v49 = vpack.c.bf16 %v1463_v48, %v1462_v47 }
 0x8a1   :  { %3612 = vmatprep.subr.bf16.mxu1 %v3611_v49 }
 0x908   :  { %v1161_v62 = vpop.permute.xlu0 %1160 }
 0x909   :  { %v1157_v59 = vpop.permute.xlu1 %1156  ;;  %v1170_v6 = vsel %vm164_vm1, %v4215_v33, %v1161_v62 }
 0x90a   :  { %v1168_v60 = vsel %vm164_vm1, %v4211_v29, %v1157_v59  ;;  %v1182_v29 = vsub.s32 4, %v4078_v12 }
 0x90b   :  { %3367 = vmatprep.mubr.msk.f32.mxu0 %vm48_vm0, %v1168_v60 }
 0x90d   :  { %v1159_v5 = vpop.permute.xlu1 %1158 }
 0x90e   :  { %v1169_v46 = vsel %vm164_vm1, %v4209_v28, %v1159_v5  ;;  %v1183_v28 = vrot.slane %v4086_v19, %v1182_v29 }
 0x90f   :  { %3368 = vmatmul.mubr.msk.f32.vlgmr.msra.gmra.mrb[14].mxu0 %vm48_vm0, %v1169_v46 }
 0x910   :  { %3370 = vmatprep.mubr.msk.f32.mxu0 %vm48_vm0, %v1170_v6 }
 0x911   :  { %v1163_v2 = vpop.permute.xlu1 %1162 }
 0x912   :  { %v1171_v7 = vsel %vm164_vm1, %v4213_v32, %v1163_v2 }
 0x913   :  { %3371 = vmatmul.mubr.msk.f32.gmra.mrb[16].mxu0 %vm48_vm0, %v1171_v7 }
 0x914   :  { %1747 = vmatprep.mubr.f32.mxu0 %v3902_v1 }
 0x9e2   :  { %v3369_v54 = vpop.f32.mrb[14].mxu0 }
 0x9e3   :  { %v1268_v33 = vadd.f32 %v3369_v54, %v1183_v28  ;;  %v1262_v9 = vpop.f32.mrb[15].mxu0 }
 0x9e4   :  { %v1263_v10 = vadd.f32 %v1262_v9, %v1183_v28 }
 0x9e5   :  { %v4283_v50 = vadd.f32 %v1268_v33, %v4015_v27  ;;  %v1347_v33 = vsub.s32 3, %v4078_v12 }
 0x9e6   :  { %v4286_v11 = vadd.f32 %v1263_v10, %v4013_v23  ;;  %v3372_v32 = vpop.f32.mrb[16].mxu0 }
 0x9e7   :  { %v1272_v13 = vpop.f32.mrb[17].mxu0  ;;  %v1288_v58 = vsel %vm164_vm1, %v4283_v50, 0.0  ;;  %v1278_v61 = vadd.f32 %v3372_v32, %v1183_v28 }
 0x9e8   :  { %v1273_v14 = vadd.f32 %v1272_v13, %v1183_v28  ;;  %1289 = vadd.xlane.f32.xlu1 %v1288_v58  ;;  %v1285_v15 = vsel %vm164_vm1, %v4286_v11, 0.0  ;;  %v1339_v28 = vsub.s32 2, %v4078_v12 }
 0x9e9   :  { %1286 = vadd.xlane.f32.xlu0 %v1285_v15  ;;  %v4296_v27 = vadd.f32 %v1278_v61, %v4019_v30  ;;  %v1348_v61 = vrot.slane %v4086_v19, %v1347_v33 }
 0x9ea   :  { %v4293_v16 = vadd.f32 %v1273_v14, %v4021_v31  ;;  %v1340_v9 = vrot.slane %v4086_v19, %v1339_v28 }
 0x9eb   :  { %v1294_v18 = vsel %vm164_vm1, %v4296_v27, 0.0 }
 0x9ec   :  { %v1291_v23 = vsel %vm164_vm1, %v4293_v16, 0.0 }
 0x9ed   :  { %1292 = vadd.xlane.f32.xlu0 %v1291_v23  ;;  %v1464_v23 = vld [vmem:[%s4718_s8 + $0x10] sm:$0xff] }
 0x9f1   :  { %1295 = vadd.xlane.f32.xlu0 %v1294_v18  ;;  %v1465_v18 = vld [vmem:[%s4718_s8 + $0x18] sm:$0xff] }
 0xa75   :  { %v1290_v21 = vpop.xlane.xlu1 %1289 }
 0xa76   :  { %v1298_v22 = vmul.f32 0.03125, %v1290_v21  ;;  %v1287_v24 = vpop.xlane.xlu0 %1286 }
 0xa77   :  { %v1297_v63 = vmul.f32 0.03125, %v1287_v24 }
 0xa78   :  { %v1302_v0 = vsub.f32 %v4283_v50, %v1298_v22 }
 0xa79   :  { %v1301_v31 = vsub.f32 %v4286_v11, %v1297_v63 }
 0xa7a   :  { %v1293_v3 = vpop.xlane.xlu0 %1292  ;;  %v1306_v25 = vmul.f32 %v1302_v0, %v1302_v0 }
 0xa7b   :  { %v1299_v30 = vmul.f32 0.03125, %v1293_v3  ;;  %v1305_v52 = vmul.f32 %v1301_v31, %v1301_v31  ;;  %v1466_v3 = vld [vmem:[%s4718_s8 + $0x20] sm:$0xff] }
 0xa7c   :  { %v1312_v53 = vsel %vm164_vm1, %v1306_v25, 0.0  ;;  %v1467_v25 = vld [vmem:[%s4718_s8 + $0x28] sm:$0xff] }
 0xa7d   :  { %v1303_v55 = vsub.f32 %v4293_v16, %v1299_v30  ;;  %1313 = vadd.xlane.f32.xlu1 %v1312_v53  ;;  %v1309_v26 = vsel %vm164_vm1, %v1305_v52, 0.0 }
 0xa7e   :  { %1310 = vadd.xlane.f32.xlu0 %v1309_v26  ;;  %v1296_v4 = vpop.xlane.xlu0 %1295 }
 0xa7f   :  { %v1300_v34 = vmul.f32 0.03125, %v1296_v4  ;;  %v1307_v35 = vmul.f32 %v1303_v55, %v1303_v55 }
 0xa81   :  { %v1304_v36 = vsub.f32 %v4296_v27, %v1300_v34  ;;  %v1315_v38 = vsel %vm164_vm1, %v1307_v35, 0.0  ;;  %v1468_v34 = vld [vmem:[%s4718_s8 + $0x30] sm:$0xff]  ;;  %v1469_v35 = vld [vmem:[%s4718_s8 + $0x38] sm:$0xff] }
 0xa82   :  { %1316 = vadd.xlane.f32.xlu0 %v1315_v38  ;;  %v1359_v38 = vsub.s32 6, %v4078_v12 }
 0xa83   :  { %v1308_v39 = vmul.f32 %v1304_v36, %v1304_v36 }
 0xa85   :  { %v1318_v37 = vsel %vm164_vm1, %v1308_v39, 0.0  ;;  %v1360_v39 = vrot.slane %v4086_v19, %v1359_v38 }
 0xa86   :  { %1319 = vadd.xlane.f32.xlu1 %v1318_v37 }
 0xb0a   :  { %v1314_v51 = vpop.xlane.xlu1 %1313 }
 0xb0b   :  { %v1322_v56 = vmul.f32 0.03125, %v1314_v51  ;;  %v1311_v57 = vpop.xlane.xlu0 %1310 }
 0xb0c   :  { %v1321_v59 = vmul.f32 0.03125, %v1311_v57  ;;  %v1573_v57 = vsub.s32 5, %v4078_v12 }
 0xb0d   :  { %v1326_v60 = vadd.f32 1e-05, %v1322_v56 }
 0xb0e   :  { %v1325_v62 = vadd.f32 1e-05, %v1321_v59  ;;  %v1574_v59 = vrot.slane %v4086_v19, %v1573_v57 }
 0xb0f   :  { %3822 = vrsqrt.f32 %v1326_v60  ;;  %v1317_v5 = vpop.xlane.xlu0 %1316 }
 0xb10   :  { %3824 = vrsqrt.f32 %v1325_v62  ;;  %v1323_v46 = vmul.f32 0.03125, %v1317_v5 }
 0xb12   :  { %v1327_v6 = vadd.f32 1e-05, %v1323_v46 }
 0xb13   :  { %v1320_v2 = vpop.xlane.xlu1 %1319 }
 0xb14   :  { %3826 = vrsqrt.f32 %v1327_v6  ;;  %v1324_v7 = vmul.f32 0.03125, %v1320_v2 }
 0xb16   :  { %v1328_v54 = vadd.f32 1e-05, %v1324_v7 }
 0xb18   :  { %3828 = vrsqrt.f32 %v1328_v54 }
 0xb19   :  { %v3823_v10 = vpop.eup %3822 }
 0xb1a   :  { %v3825_v32 = vpop.eup %3824  ;;  %v1334_v13 = vmul.f32 %v3823_v10, %v1302_v0  ;;  %v3615_v0 = vpack.c.bf16 %v1465_v18, %v1464_v23 }
 0xb1b   :  { %v1333_v58 = vmul.f32 %v3825_v32, %v1301_v31 }
 0xb1c   :  { %v1342_v14 = vmul.f32 %v1340_v9, %v1334_v13 }
 0xb1d   :  { %v1341_v15 = vmul.f32 %v1340_v9, %v1333_v58 }
 0xb1e   :  { %v3827_v21 = vpop.eup %3826  ;;  %v1350_v63 = vadd.f32 %v1348_v61, %v1342_v14 }
 0xb1f   :  { %v1349_v22 = vadd.f32 %v1348_v61, %v1341_v15  ;;  %v1335_v24 = vmul.f32 %v3827_v21, %v1303_v55  ;;  %v3619_v55 = vpack.c.bf16 %v1467_v25, %v1466_v3 }
 0xb21   :  { %3381 = vmatprep.mubr.msk.f32.mxu1 %vm164_vm1, %v1349_v22  ;;  %v1343_v31 = vmul.f32 %v1340_v9, %v1335_v24 }
 0xb22   :  { %v3829_v30 = vpop.eup %3828  ;;  %3382 = vmatmul.mubr.msk.f32.vlgmr.msra.gmra.mrb[14].mxu1 %vm164_vm1, %v1350_v63 }
 0xb23   :  { %v1351_v52 = vadd.f32 %v1348_v61, %v1343_v31  ;;  %v1336_v53 = vmul.f32 %v3829_v30, %v1304_v36  ;;  %3614 = vmatpush3.bf16.msra.mxu1 %v3611_v49  ;;  %v3623_v36 = vpack.c.bf16 %v1469_v35, %v1468_v34  ;;  %v3067_v34 = vld [vmem:[%s4714_s4 + $0x58] sm:$0xff] }
 0xb24   :  { %3616 = vmatprep.subr.bf16.mxu1 %v3615_v0 }
 0xb25   :  { %3384 = vmatprep.mubr.msk.f32.mxu1 %vm164_vm1, %v1351_v52  ;;  %v1344_v26 = vmul.f32 %v1340_v9, %v1336_v53 }
 0xb27   :  { %v1352_v4 = vadd.f32 %v1348_v61, %v1344_v26  ;;  %3618 = vmatpush3.bf16.msra.mxu1 %v3615_v0 }
 0xb28   :  { %3620 = vmatprep.subr.bf16.mxu1 %v3619_v55 }
 0xb29   :  { %3385 = vmatmul.mubr.msk.f32.gmra.mrb[16].mxu1 %vm164_vm1, %v1352_v4  ;;  %v3065_v4 = vld [vmem:[%s4714_s4 + $0x48] sm:$0xff] }
 0xb2a   :  { %v3627_v35 = vpack.c.bf16 %v3067_v34, %v3065_v4 }
 0xb2b   :  { %3622 = vmatpush3.bf16.msra.mxu1 %v3619_v55 }
 0xb2c   :  { %3624 = vmatprep.subr.bf16.mxu1 %v3623_v36  ;;  %3628 = vmatprep.subr.bf16.mxu0 %v3627_v35 }
 0xb2f   :  { %3626 = vmatpush3.bf16.msra.mxu1 %v3623_v36  ;;  %v3064_v36 = vld [vmem:[%s4714_s4 + $0x40] sm:$0xff] }
 0xbf5   :  { %v3383_v37 = vpop.f32.mrb[14].mxu1 }
 0xbf6   :  { %v1445_v40 = vadd.f32 %v3383_v37, %v1360_v39  ;;  %v1439_v41 = vpop.f32.mrb[15].mxu1 }
 0xbf7   :  { %v1440_v42 = vadd.f32 %v1439_v41, %v1360_v39  ;;  %v3071_v41 = vld [vmem:[%s4714_s4 + $0x78] sm:$0xff] }
 0xbf8   :  { %v1459_v44 = vmax.f32 %v1445_v40, 0.0  ;;  %v3069_v40 = vld [vmem:[%s4714_s4 + $0x68] sm:$0xff] }
 0xbf9   :  { %v1458_v43 = vmax.f32 %v1440_v42, 0.0  ;;  %v3631_v42 = vpack.c.bf16 %v3071_v41, %v3069_v40 }
 0xbfb   :  { %3403 = vmatprep.mubr.msk.f32.mxu1 %vm48_vm0, %v1458_v43  ;;  %v3068_v43 = vld [vmem:[%s4714_s4 + $0x60] sm:$0xff] }
 0xbfc   :  { %v3386_v45 = vpop.f32.mrb[16].mxu1  ;;  %3404 = vmatmul.mubr.msk.f32.vlgmr.msra.gmra.mrb[18].mxu1 %vm48_vm0, %v1459_v44  ;;  %v3070_v44 = vld [vmem:[%s4714_s4 + $0x70] sm:$0xff] }
 0xbfd   :  { %v1455_v47 = vadd.f32 %v3386_v45, %v1360_v39  ;;  %v1449_v48 = vpop.f32.mrb[17].mxu1  ;;  %v3633_v45 = vpack.c.bf16 %v3070_v44, %v3068_v43 }
 0xbfe   :  { %v1450_v49 = vadd.f32 %v1449_v48, %v1360_v39  ;;  %v3066_v39 = vld [vmem:[%s4714_s4 + $0x50] sm:$0xff] }
 0xbff   :  { %v1461_v56 = vmax.f32 %v1455_v47, 0.0  ;;  %v3629_v37 = vpack.c.bf16 %v3066_v39, %v3064_v36 }
 0xc00   :  { %v1460_v51 = vmax.f32 %v1450_v49, 0.0 }
 0xc01   :  { %3630 = vmatpush1.bf16.msra.mxu0 %v3629_v37 }
 0xc02   :  { %3406 = vmatprep.mubr.msk.f32.mxu1 %vm48_vm0, %v1460_v51  ;;  %3632 = vmatprep.subr.bf16.mxu0 %v3631_v42 }
 0xc03   :  { %3407 = vmatmul.mubr.msk.f32.gmra.mrb[20].mxu1 %vm48_vm0, %v1461_v56 }
 0xc05   :  { %3634 = vmatpush1.bf16.msra.mxu0 %v3633_v45 }
 0xccf   :  { %v3405_v60 = vpop.f32.mrb[18].mxu1 }
 0xcd0   :  { %v1568_v62 = vadd.f32 %v3405_v60, %v4283_v50  ;;  %v1548_v5 = vpop.f32.mrb[19].mxu1 }
 0xcd1   :  { %v1567_v46 = vadd.f32 %v1548_v5, %v4286_v11 }
 0xcd2   :  { %v4372_v6 = vadd.f32 %v1574_v59, %v1568_v62 }
 0xcd3   :  { %v4374_v2 = vadd.f32 %v1574_v59, %v1567_v46 }
 0xcd4   :  { %v1584_v7 = vsel %vm164_vm1, %v4372_v6, 0.0 }
 0xcd5   :  { %1585 = vadd.xlane.f32.xlu1 %v1584_v7  ;;  %v1581_v54 = vsel %vm164_vm1, %v4374_v2, 0.0 }
 0xcd6   :  { %1582 = vadd.xlane.f32.xlu0 %v1581_v54  ;;  %v3408_v9 = vpop.f32.mrb[20].mxu1 }
 0xcd7   :  { %v1570_v19 = vadd.f32 %v3408_v9, %v4296_v27  ;;  %v1558_v10 = vpop.f32.mrb[21].mxu1  ;;  %v4425_v9 = vld [vmem:[%s4719_s9 + $0x8] sm:$0xff] }
 0xcd8   :  { %v1569_v50 = vadd.f32 %v1558_v10, %v4293_v16  ;;  %v1636_v10 = vrot.slane %v4425_v9, %v4081_v17 }
 0xcd9   :  { %v4382_v32 = vadd.f32 %v1574_v59, %v1570_v19 }
 0xcda   :  { %v4384_v11 = vadd.f32 %v1574_v59, %v1569_v50 }
 0xcdb   :  { %v1590_v13 = vsel %vm164_vm1, %v4382_v32, 0.0 }
 0xcdc   :  { %1591 = vadd.xlane.f32.xlu1 %v1590_v13  ;;  %v1587_v58 = vsel %vm164_vm1, %v4384_v11, 0.0  ;;  %v1644_v13 = vrot.slane %v4425_v9, %v4089_v20 }
 0xcdd   :  { %1588 = vadd.xlane.f32.xlu0 %v1587_v58 }
 0xd62   :  { %v1586_v61 = vpop.xlane.xlu1 %1585 }
 0xd63   :  { %v1594_v14 = vmul.f32 0.03125, %v1586_v61  ;;  %v1583_v15 = vpop.xlane.xlu0 %1582 }
 0xd64   :  { %v1593_v23 = vmul.f32 0.03125, %v1583_v15 }
 0xd65   :  { %v1598_v27 = vsub.f32 %v4372_v6, %v1594_v14 }
 0xd66   :  { %v1597_v16 = vsub.f32 %v4374_v2, %v1593_v23 }
 0xd67   :  { %v1602_v18 = vmul.f32 %v1598_v27, %v1598_v27 }
 0xd68   :  { %v1601_v21 = vmul.f32 %v1597_v16, %v1597_v16 }
 0xd69   :  { %v1592_v22 = vpop.xlane.xlu1 %1591  ;;  %v1608_v24 = vsel %vm164_vm1, %v1602_v18, 0.0 }
 0xd6a   :  { %v1596_v63 = vmul.f32 0.03125, %v1592_v22  ;;  %1609 = vadd.xlane.f32.xlu1 %v1608_v24  ;;  %v1589_v0 = vpop.xlane.xlu0 %1588  ;;  %v1605_v31 = vsel %vm164_vm1, %v1601_v21, 0.0 }
 0xd6b   :  { %v1595_v3 = vmul.f32 0.03125, %v1589_v0  ;;  %1606 = vadd.xlane.f32.xlu0 %v1605_v31 }
 0xd6c   :  { %v1600_v25 = vsub.f32 %v4382_v32, %v1596_v63 }
 0xd6d   :  { %v1599_v30 = vsub.f32 %v4384_v11, %v1595_v3  ;;  %v3072_v3 = vld [vmem:[%s4715_s5 + $0x2] sm:$0x3] }
 0xd6e   :  { %v1604_v52 = vmul.f32 %v1600_v25, %v1600_v25 }
 0xd6f   :  { %v1603_v53 = vmul.f32 %v1599_v30, %v1599_v30 }
 0xd70   :  { %v1614_v55 = vsel %vm164_vm1, %v1604_v52, 0.0 }
 0xd71   :  { %1615 = vadd.xlane.f32.xlu1 %v1614_v55  ;;  %v1611_v26 = vsel %vm164_vm1, %v1603_v53, 0.0  ;;  %v1668_v55 = vrot.slane %v3072_v3, %v4089_v20 }
 0xd72   :  { %1612 = vadd.xlane.f32.xlu0 %v1611_v26 }
 0xdf7   :  { %v1610_v47 = vpop.xlane.xlu1 %1609 }
 0xdf8   :  { %v1618_v48 = vmul.f32 0.03125, %v1610_v47  ;;  %v1607_v49 = vpop.xlane.xlu0 %1606 }
 0xdf9   :  { %v1617_v51 = vmul.f32 0.03125, %v1607_v49 }
 0xdfa   :  { %v1622_v56 = vadd.f32 1e-05, %v1618_v48 }
 0xdfb   :  { %v1621_v59 = vadd.f32 1e-05, %v1617_v51 }
 0xdfc   :  { %3830 = vrsqrt.f32 %v1622_v56 }
 0xdfd   :  { %3832 = vrsqrt.f32 %v1621_v59 }
 0xdfe   :  { %v1616_v60 = vpop.xlane.xlu1 %1615 }
 0xdff   :  { %v1620_v62 = vmul.f32 0.03125, %v1616_v60  ;;  %v1613_v5 = vpop.xlane.xlu0 %1612 }
 0xe00   :  { %v1619_v46 = vmul.f32 0.03125, %v1613_v5 }
 0xe01   :  { %v1624_v7 = vadd.f32 1e-05, %v1620_v62 }
 0xe02   :  { %v1623_v54 = vadd.f32 1e-05, %v1619_v46 }
 0xe03   :  { %3834 = vrsqrt.f32 %v1624_v7 }
 0xe04   :  { %3836 = vrsqrt.f32 %v1623_v54 }
 0xe06   :  { %v3831_v19 = vpop.eup %3830 }
 0xe07   :  { %v3833_v50 = vpop.eup %3832  ;;  %v1630_v61 = vmul.f32 %v3831_v19, %v1598_v27 }
 0xe08   :  { %v1629_v58 = vmul.f32 %v3833_v50, %v1597_v16 }
 0xe09   :  { %v1638_v23 = vmul.f32 %v1636_v10, %v1630_v61 }
 0xe0a   :  { %v1637_v14 = vmul.f32 %v1636_v10, %v1629_v58 }
 0xe0b   :  { %v1646_v24 = vadd.f32 %v1644_v13, %v1638_v23 }
 0xe0c   :  { %v1645_v15 = vadd.f32 %v1644_v13, %v1637_v14 }
 0xe0d   :  { %v3835_v18 = vpop.eup %3834 }
 0xe0e   :  { %v3837_v21 = vpop.eup %3836  ;;  %3073 = vmatmul.mubr.msk.f32.vlgmr.msra.gmra.mrb[18].mxu0 %vm164_vm1, %v1645_v15  ;;  %v1632_v63 = vmul.f32 %v3835_v18, %v1600_v25  ;;  %v1664_v25 = vrot.slane %v3072_v3, %v4081_v17 }
 0xe0f   :  { %1753 = vmatprep.mubr.f32.mxu0 %v3902_v1  ;;  %v1631_v22 = vmul.f32 %v3837_v21, %v1599_v30 }
 0xe10   :  { %v1640_v16 = vmul.f32 %v1636_v10, %v1632_v63 }
 0xe11   :  { %v1639_v0 = vmul.f32 %v1636_v10, %v1631_v22 }
 0xe12   :  { %3074 = vmatmul.mubr.msk.f32.gmra.mrb[20].mxu0 %vm164_vm1, %v1646_v24  ;;  %v1648_v27 = vadd.f32 %v1644_v13, %v1640_v16 }
 0xe13   :  { %1759 = vmatprep.mubr.f32.mxu0 %v3902_v1  ;;  %v1647_v31 = vadd.f32 %v1644_v13, %v1639_v0 }
 0xe16   :  { %3075 = vmatmul.mubr.msk.f32.gmra.mrb[22].mxu0 %vm164_vm1, %v1647_v31 }
 0xe17   :  { %1765 = vmatprep.mubr.f32.mxu0 %v3902_v1 }
 0xe1a   :  { %3076 = vmatmul.mubr.msk.f32.gmra.mrb[24].mxu0 %vm164_vm1, %v1648_v27 }
 0xee1   :  { %v1749_v30 = vpop.f32.mrb[18].mxu0 }
 0xee2   :  { %v4442_v52 = vadd.f32 %v1749_v30, %v1664_v25  ;;  %v1751_v53 = vpop.f32.mrb[19].mxu0 }
 0xee3   :  { %v4449_v34 = vadd.f32 %v1751_v53, %v1668_v55 }
 0xee4   :  { %3413 = vmatprep.mubr.msk.f32.mxu1 %vm164_vm1, %v4442_v52 }
 0xee5   :  { %v1755_v26 = vpop.f32.mrb[20].mxu0 }
 0xee6   :  { %v4447_v1 = vadd.f32 %v1755_v26, %v1664_v25  ;;  %v1757_v4 = vpop.f32.mrb[21].mxu0 }
 0xee7   :  { %v4451_v35 = vadd.f32 %v1757_v4, %v1668_v55 }
 0xee8   :  { %v4455_v17 = vpack.i.bf16 %v4447_v1, %v4442_v52 }
 0xee9   :  { %v3772_v36 = vpack.i.bf16 %v4451_v35, %v4449_v34  ;;  %v3647_v20 = vpack.c.bf16 %v4451_v35, %v4449_v34  ;;  %v1761_v39 = vpop.f32.mrb[22].mxu0 }
 0xeea   :  { %v4461_v37 = vadd.f32 %v1761_v39, %v1664_v25  ;;  %3753 = vrot.lane.b32.xlu0 %v4455_v17, %s3903_s18  ;;  %v1763_v40 = vpop.f32.mrb[23].mxu0 }
 0xeeb   :  { %v4469_v44 = vadd.f32 %v1763_v40, %v1668_v55 }
 0xeec   :  { %3420 = vmatprep.mubr.msk.f32.mxu0 %vm164_vm1, %v4461_v37 }
 0xeed   :  { %v1767_v41 = vpop.f32.mrb[24].mxu0 }
 0xeee   :  { %v4467_v42 = vadd.f32 %v1767_v41, %v1664_v25  ;;  %v1769_v43 = vpop.f32.mrb[25].mxu0 }
 0xeef   :  { %v4471_v45 = vadd.f32 %v1769_v43, %v1668_v55 }
 0xef0   :  { %v4475_v47 = vpack.i.bf16 %v4467_v42, %v4461_v37 }
 0xef1   :  { %v3777_v48 = vpack.i.bf16 %v4471_v45, %v4469_v44  ;;  %v4481_v49 = vpack.c.bf16 %v4471_v45, %v4469_v44 }
 0xef2   :  { %3758 = vrot.lane.b32.xlu1 %v4475_v47, %s3903_s18 }
 0xf5c   :  { %v3754_v51 = vpop.permute.xlu0 %3753 }
 0xf5d   :  { %v3756_v56 = vunpack.i.h.bf16 %v3754_v51  ;;  %v3755_v59 = vunpack.i.l.bf16 %v3754_v51 }
 0xf5f   :  { %v3635_v60 = vpack.c.bf16 %v3756_v56, %v3755_v59 }
 0xf61   :  { %3637 = vmatprep.subr.msk.bf16.mxu1 %vm4155_vm2, %v3635_v60 }
 0xf62   :  { %3640 = vmatpush3.bf16.xpose.msk.msra.mxu1 %vm4155_vm2, %v3635_v60 }
 0xf63   :  { %3648 = vmatprep.subr.bf16.mxu1 %v3647_v20 }
 0xf64   :  { %v3759_v62 = vpop.permute.xlu1 %3758 }
 0xf65   :  { %v3761_v5 = vunpack.i.h.bf16 %v3759_v62  ;;  %v3760_v46 = vunpack.i.l.bf16 %v3759_v62 }
 0xf67   :  { %v3641_v7 = vpack.c.bf16 %v3761_v5, %v3760_v46 }
 0xf69   :  { %3414 = vmatmul.mubr.msk.f32.vlgmr.msra.gmra.mrb[22].mxu1 %vm164_vm1, %v4447_v1  ;;  %3643 = vmatprep.subr.msk.bf16.mxu0 %vm4155_vm2, %v3641_v7 }
 0xf6a   :  { %3646 = vmatpush3.bf16.xpose.msk.msra.mxu0 %vm4155_vm2, %v3641_v7  ;;  %3650 = vmatpush3.bf16.msra.mxu1 %v3647_v20 }
 0xf6b   :  { %3652 = vmatprep.subr.bf16.mxu1 %v4481_v49 }
 0xf71   :  { %3421 = vmatmul.mubr.msk.f32.vlgmr.msra.gmra.mrb[26].mxu0 %vm164_vm1, %v4467_v42 }
0x103c   :  { %v3415_v54 = vpop.f32.mrb[22].mxu1 }
0x103d   :  { %v1951_v19 = vmul.f32 0.25, %v3415_v54  ;;  %v1852_v10 = vpop.f32.mrb[23].mxu1 }
0x103e   :  { %v1950_v50 = vmul.f32 0.25, %v1852_v10 }
0x103f   :  { %v1957_v13 = vsel %vm537_vm3, %v1951_v19, -inf }
0x1040   :  { %1958 = vmax.xlane.f32.xlu0 %v1957_v13  ;;  %v1954_v58 = vsel %vm537_vm3, %v1950_v50, -inf }
0x1041   :  { %1955 = vmax.xlane.f32.xlu1 %v1954_v58 }
0x1044   :  { %v3422_v61 = vpop.f32.mrb[26].mxu0 }
0x1045   :  { %v1953_v14 = vmul.f32 0.25, %v3422_v61  ;;  %v1941_v15 = vpop.f32.mrb[27].mxu0 }
0x1046   :  { %v1952_v23 = vmul.f32 0.25, %v1941_v15 }
0x1047   :  { %v1963_v18 = vsel %vm537_vm3, %v1953_v14, -inf }
0x1048   :  { %1964 = vmax.xlane.f32.xlu1 %v1963_v18  ;;  %v1960_v21 = vsel %vm537_vm3, %v1952_v23, -inf }
0x1049   :  { %1961 = vmax.xlane.f32.xlu0 %v1960_v21 }
0x10cd   :  { %v1959_v22 = vpop.xlane.xlu0 %1958 }
0x10ce   :  { %v1967_v24 = vsub.f32 %v1951_v19, %v1959_v22  ;;  %v1956_v63 = vpop.xlane.xlu1 %1955 }
0x10cf   :  { %v1966_v0 = vsub.f32 %v1950_v50, %v1956_v63 }
0x10d0   :  { %v1972_v31 = vmul.f32 1.442695, %v1967_v24 }
0x10d1   :  { %v1970_v16 = vmul.f32 1.442695, %v1966_v0 }
0x10d2   :  { %3838 = vpow2.f32 %v1972_v31 }
0x10d3   :  { %3840 = vpow2.f32 %v1970_v16 }
0x10d5   :  { %v1965_v27 = vpop.xlane.xlu1 %1964 }
0x10d6   :  { %v1969_v3 = vsub.f32 %v1953_v14, %v1965_v27  ;;  %v1962_v25 = vpop.xlane.xlu0 %1961 }
0x10d7   :  { %v1968_v30 = vsub.f32 %v1952_v23, %v1962_v25 }
0x10d8   :  { %v1976_v53 = vmul.f32 1.442695, %v1969_v3 }
0x10d9   :  { %v1974_v55 = vmul.f32 1.442695, %v1968_v30 }
0x10da   :  { %3842 = vpow2.f32 %v1976_v53 }
0x10db   :  { %3844 = vpow2.f32 %v1974_v55 }
0x10dc   :  { %v3839_v26 = vpop.eup %3838 }
0x10dd   :  { %v3841_v4 = vpop.eup %3840  ;;  %v1981_v20 = vsel %vm537_vm3, %v3839_v26, 0.0 }
0x10de   :  { %1982 = vadd.xlane.f32.xlu1 %v1981_v20  ;;  %v1978_v39 = vsel %vm537_vm3, %v3841_v4, 0.0 }
0x10df   :  { %1979 = vadd.xlane.f32.xlu0 %v1978_v39 }
0x10e4   :  { %v3843_v40 = vpop.eup %3842 }
0x10e5   :  { %v3845_v41 = vpop.eup %3844  ;;  %v1987_v43 = vsel %vm537_vm3, %v3843_v40, 0.0 }
0x10e6   :  { %1988 = vadd.xlane.f32.xlu1 %v1987_v43  ;;  %v1984_v51 = vsel %vm537_vm3, %v3845_v41, 0.0 }
0x10e7   :  { %1985 = vadd.xlane.f32.xlu0 %v1984_v51 }
0x10f7   :  { %3768 = vrot.lane.b32.xlu1 %v4475_v47, %s3905_s20 }
0x10fb   :  { %2160 = vrot.lane.b32.xlu1 %v4442_v52, %s3904_s19 }
0x10fd   :  { %3763 = vrot.lane.b32.xlu0 %v4455_v17, %s3905_s20 }
0x10ff   :  { %2162 = vrot.lane.b32.xlu1 %v4447_v1, %s3904_s19 }
0x1101   :  { %2251 = vrot.lane.b32.xlu0 %v4461_v37, %s3904_s19 }
0x1103   :  { %2253 = vrot.lane.b32.xlu1 %v4467_v42, %s3904_s19 }
0x116b   :  { %v1983_v56 = vpop.xlane.xlu1 %1982 }
0x116c   :  { %3846 = vrcp.f32 %v1983_v56  ;;  %v1980_v59 = vpop.xlane.xlu0 %1979 }
0x116d   :  { %3848 = vrcp.f32 %v1980_v59 }
0x1173   :  { %v1989_v47 = vpop.xlane.xlu1 %1988 }
0x1174   :  { %3850 = vrcp.f32 %v1989_v47  ;;  %v1986_v60 = vpop.xlane.xlu0 %1985 }
0x1175   :  { %3852 = vrcp.f32 %v1986_v60 }
0x1176   :  { %v3847_v52 = vpop.eup %3846 }
0x1177   :  { %v3849_v62 = vpop.eup %3848  ;;  %v3769_v17 = vpop.permute.xlu1 %3768  ;;  %v1993_v54 = vmul.f32 %v3847_v52, %v3839_v26 }
0x1178   :  { %v3771_v5 = vunpack.i.h.bf16 %v3769_v17  ;;  %v3770_v46 = vunpack.i.l.bf16 %v3769_v17  ;;  %v3764_v1 = vpop.permute.xlu0 %3763  ;;  %v1991_v7 = vmul.f32 %v3849_v62, %v3841_v4 }
0x1179   :  { %v3766_v37 = vunpack.i.h.bf16 %v3764_v1  ;;  %v3765_v19 = vunpack.i.l.bf16 %v3764_v1 }
0x117a   :  { %v3661_v10 = vpack.c.bf16 %v3771_v5, %v3770_v46  ;;  %3427 = vmatprep.mubr.msk.f32.mxu1 %vm537_vm3, %v1991_v7 }
0x117b   :  { %v3655_v42 = vpack.c.bf16 %v3766_v37, %v3765_v19  ;;  %3428 = vmatmul.mubr.msk.f32.vlgmr.msra.gmra.mrb[24].mxu1 %vm537_vm3, %v1993_v54  ;;  %v2161_v50 = vpop.permute.xlu1 %2160 }
0x117c   :  { %3654 = vmatpush3.bf16.msra.mxu1 %v4481_v49  ;;  %3441 = vmatprep.mubr.msk.f32.mxu0 %vm164_vm1, %v2161_v50  ;;  %v2252_v15 = vpop.permute.xlu0 %2251 }
0x117d   :  { %3663 = vmatprep.subr.msk.bf16.mxu1 %vm4155_vm2, %v3661_v10  ;;  %3657 = vmatprep.subr.msk.bf16.mxu0 %vm4155_vm2, %v3655_v42 }
0x117e   :  { %v3851_v13 = vpop.eup %3850  ;;  %3660 = vmatpush3.bf16.xpose.msk.msra.mxu0 %vm4155_vm2, %v3655_v42 }
0x117f   :  { %v3853_v58 = vpop.eup %3852  ;;  %v1997_v14 = vmul.f32 %v3851_v13, %v3843_v40  ;;  %v2163_v49 = vpop.permute.xlu1 %2162 }
0x1180   :  { %v1995_v61 = vmul.f32 %v3853_v58, %v3845_v41 }
0x1182   :  { %3434 = vmatprep.mubr.msk.f32.mxu1 %vm537_vm3, %v1995_v61 }
0x1183   :  { %3435 = vmatmul.mubr.msk.f32.vlgmr.msra.gmra.mrb[26].mxu1 %vm537_vm3, %v1997_v14  ;;  %v2254_v23 = vpop.permute.xlu1 %2253 }
0x1184   :  { %3448 = vmatprep.mubr.msk.f32.mxu1 %vm164_vm1, %v2252_v15 }
0x1185   :  { %3666 = vmatpush3.bf16.xpose.msk.msra.mxu1 %vm4155_vm2, %v3661_v10  ;;  %3442 = vmatmul.mubr.msk.f32.vlgmr.msra.gmra.mrb[28].mxu0 %vm164_vm1, %v2163_v49 }
0x118c   :  { %3449 = vmatmul.mubr.msk.f32.vlgmr.msra.gmra.mrb[28].mxu1 %vm164_vm1, %v2254_v23 }
0x124e   :  { %v4535_v18 = vpop.f32.mrb[24].mxu1 }
0x124f   :  { %v4537_v21 = vpop.f32.mrb[25].mxu1 }
0x1256   :  { %v4539_v22 = vpop.f32.mrb[26].mxu1 }
0x1257   :  { %v4541_v24 = vpop.f32.mrb[27].mxu1 }
0x1258   :  { %v3443_v63 = vpop.f32.mrb[28].mxu0 }
0x1259   :  { %v2343_v0 = vmul.f32 0.25, %v3443_v63  ;;  %v2242_v31 = vpop.f32.mrb[29].mxu0 }
0x125a   :  { %v2342_v16 = vmul.f32 0.25, %v2242_v31 }
0x125b   :  { %v2349_v8 = vsel %vm537_vm3, %v2343_v0, -inf }
0x125c   :  { %2350 = vmax.xlane.f32.xlu1 %v2349_v8  ;;  %v2346_v27 = vsel %vm537_vm3, %v2342_v16, -inf  ;;  %v3102_v8 = vld [vmem:[%s4716_s6 + $0x48] sm:$0xff] }
0x125d   :  { %2347 = vmax.xlane.f32.xlu0 %v2346_v27  ;;  %v3103_v27 = vld [vmem:[%s4716_s6 + $0x50] sm:$0xff] }
0x125f   :  { %v3450_v3 = vpop.f32.mrb[28].mxu1 }
0x1260   :  { %v2333_v25 = vpop.f32.mrb[29].mxu1  ;;  %v2345_v53 = vmul.f32 0.25, %v3450_v3 }
0x1261   :  { %v2344_v30 = vmul.f32 0.25, %v2333_v25  ;;  %v3104_v25 = vld [vmem:[%s4716_s6 + $0x58] sm:$0xff] }
0x1262   :  { %v2355_v26 = vsel %vm537_vm3, %v2345_v53, -inf }
0x1263   :  { %v2352_v55 = vsel %vm537_vm3, %v2344_v30, -inf }
0x1264   :  { %2353 = vmax.xlane.f32.xlu0 %v2352_v55  ;;  %v3106_v55 = vld [vmem:[%s4716_s6 + $0x68] sm:$0xff] }
0x1268   :  { %2356 = vmax.xlane.f32.xlu0 %v2355_v26 }
0x12e9   :  { %v2351_v4 = vpop.xlane.xlu1 %2350 }
0x12ea   :  { %v2359_v20 = vsub.f32 %v2343_v0, %v2351_v4  ;;  %v2348_v39 = vpop.xlane.xlu0 %2347  ;;  %v3107_v4 = vld [vmem:[%s4716_s6 + $0x70] sm:$0xff] }
0x12eb   :  { %v2358_v40 = vsub.f32 %v2342_v16, %v2348_v39  ;;  %v3101_v16 = vld [vmem:[%s4716_s6 + $0x40] sm:$0xff] }
0x12ec   :  { %v2364_v41 = vmul.f32 1.442695, %v2359_v20  ;;  %v3675_v3 = vpack.c.bf16 %v3102_v8, %v3101_v16  ;;  %v3108_v20 = vld [vmem:[%s4716_s6 + $0x78] sm:$0xff] }
0x12ed   :  { %v2362_v43 = vmul.f32 1.442695, %v2358_v40  ;;  %v3687_v39 = vpack.c.bf16 %v3108_v20, %v3107_v4  ;;  %v3121_v4 = vld [vmem:[%s4718_s8 + $0x40] sm:$0xff]  ;;  %v3122_v20 = vld [vmem:[%s4718_s8 + $0x48] sm:$0xff] }
0x12ee   :  { %3854 = vpow2.f32 %v2364_v41 }
0x12ef   :  { %3856 = vpow2.f32 %v2362_v43 }
0x12f1   :  { %v2354_v51 = vpop.xlane.xlu0 %2353 }
0x12f2   :  { %v2360_v56 = vsub.f32 %v2344_v30, %v2354_v51  ;;  %v3679_v30 = vpack.c.bf16 %v3104_v25, %v3103_v27  ;;  %v3114_v25 = vld [vmem:[%s4717_s7 + $0x28] sm:$0xff] }
0x12f4   :  { %v2366_v59 = vmul.f32 1.442695, %v2360_v56 }
0x12f5   :  { %v2357_v47 = vpop.xlane.xlu0 %2356 }
0x12f6   :  { %3858 = vpow2.f32 %v2366_v59  ;;  %v2361_v60 = vsub.f32 %v2345_v53, %v2357_v47  ;;  %v3105_v53 = vld [vmem:[%s4716_s6 + $0x60] sm:$0xff] }
0x12f7   :  { %v3683_v26 = vpack.c.bf16 %v3106_v55, %v3105_v53  ;;  %v3115_v53 = vld [vmem:[%s4717_s7 + $0x30] sm:$0xff]  ;;  %v3116_v55 = vld [vmem:[%s4717_s7 + $0x38] sm:$0xff] }
0x12f8   :  { %v3855_v52 = vpop.eup %3854  ;;  %v2368_v62 = vmul.f32 1.442695, %v2361_v60 }
0x12f9   :  { %v3857_v17 = vpop.eup %3856  ;;  %v2373_v5 = vsel %vm537_vm3, %v3855_v52, 0.0 }
0x12fa   :  { %3860 = vpow2.f32 %v2368_v62  ;;  %2374 = vadd.xlane.f32.xlu1 %v2373_v5  ;;  %v2370_v46 = vsel %vm537_vm3, %v3857_v17, 0.0 }
0x12fb   :  { %2371 = vadd.xlane.f32.xlu0 %v2370_v46 }
0x1300   :  { %v3859_v1 = vpop.eup %3858 }
0x1301   :  { %v2376_v7 = vsel %vm537_vm3, %v3859_v1, 0.0 }
0x1302   :  { %2377 = vadd.xlane.f32.xlu0 %v2376_v7 }
0x1304   :  { %v3861_v54 = vpop.eup %3860 }
0x1305   :  { %v2379_v37 = vsel %vm537_vm3, %v3861_v54, 0.0 }
0x1306   :  { %2380 = vadd.xlane.f32.xlu1 %v2379_v37 }
0x1317   :  { %3778 = vrot.lane.b32.xlu1 %v3777_v48, %s3904_s19 }
0x1318   :  { %3773 = vrot.lane.b32.xlu0 %v3772_v36, %s3904_s19 }
0x1387   :  { %v2375_v10 = vpop.xlane.xlu1 %2374 }
0x1388   :  { %v2372_v19 = vpop.xlane.xlu0 %2371 }
0x1389   :  { %3862 = vrcp.f32 %v2372_v19 }
0x138a   :  { %3864 = vrcp.f32 %v2375_v10 }
0x138f   :  { %v2378_v42 = vpop.xlane.xlu0 %2377 }
0x1390   :  { %3866 = vrcp.f32 %v2378_v42 }
0x1393   :  { %v3863_v50 = vpop.eup %3862  ;;  %v2381_v13 = vpop.xlane.xlu1 %2380 }
0x1394   :  { %v3774_v58 = vpop.permute.xlu0 %3773  ;;  %3868 = vrcp.f32 %v2381_v13  ;;  %v2383_v15 = vmul.f32 %v3863_v50, %v3857_v17  ;;  %v3865_v45 = vpop.eup %3864 }
0x1395   :  { %v3776_v61 = vunpack.i.h.bf16 %v3774_v58  ;;  %v3775_v14 = vunpack.i.l.bf16 %v3774_v58  ;;  %v2385_v49 = vmul.f32 %v3865_v45, %v3855_v52 }
0x1396   :  { %3455 = vmatprep.mubr.msk.f32.mxu0 %vm537_vm3, %v2383_v15 }
0x1397   :  { %v3667_v44 = vpack.c.bf16 %v3776_v61, %v3775_v14  ;;  %v3779_v48 = vpop.permute.xlu1 %3778 }
0x1398   :  { %v3781_v34 = vunpack.i.h.bf16 %v3779_v48  ;;  %v3780_v35 = vunpack.i.l.bf16 %v3779_v48 }
0x1399   :  { %3668 = vmatprep.subr.bf16.mxu0 %v3667_v44 }
0x139a   :  { %3670 = vmatpush3.bf16.msra.mxu0 %v3667_v44  ;;  %v3867_v36 = vpop.eup %3866  ;;  %v3671_v23 = vpack.c.bf16 %v3781_v34, %v3780_v35 }
0x139b   :  { %v2387_v63 = vmul.f32 %v3867_v36, %v3859_v1  ;;  %3676 = vmatprep.subr.bf16.mxu0 %v3675_v3 }
0x139c   :  { %3672 = vmatprep.subr.bf16.mxu1 %v3671_v23 }
0x139d   :  { %3456 = vmatmul.mubr.msk.f32.vlgmr.msra.gmra.mrb[30].mxu0 %vm537_vm3, %v2385_v49  ;;  %3674 = vmatpush3.bf16.msra.mxu1 %v3671_v23 }
0x139e   :  { %3462 = vmatprep.mubr.msk.f32.mxu1 %vm537_vm3, %v2387_v63  ;;  %v3869_v0 = vpop.eup %3868  ;;  %3678 = vmatpush3.bf16.msra.mxu0 %v3675_v3  ;;  %v3113_v3 = vld [vmem:[%s4717_s7 + $0x20] sm:$0xff] }
0x139f   :  { %v2389_v31 = vmul.f32 %v3869_v0, %v3861_v54  ;;  %3680 = vmatprep.subr.bf16.mxu0 %v3679_v30 }
0x13a1   :  { %3463 = vmatmul.mubr.msk.f32.vlgmr.msra.gmra.mrb[30].mxu1 %vm537_vm3, %v2389_v31 }
0x13a2   :  { %3682 = vmatpush3.bf16.msra.mxu0 %v3679_v30  ;;  %v3691_v30 = vpack.c.bf16 %v3114_v25, %v3113_v3 }
0x13a3   :  { %3684 = vmatprep.subr.bf16.mxu0 %v3683_v26 }
0x13a4   :  { %3692 = vmatprep.subr.bf16.mxu1 %v3691_v30 }
0x13a5   :  { %3694 = vmatpush3.bf16.msra.mxu1 %v3691_v30 }
0x13a6   :  { %3686 = vmatpush3.bf16.msra.mxu0 %v3683_v26  ;;  %v3695_v26 = vpack.c.bf16 %v3116_v55, %v3115_v53 }
0x13a7   :  { %3688 = vmatprep.subr.bf16.mxu0 %v3687_v39 }
0x13a8   :  { %3696 = vmatprep.subr.bf16.mxu1 %v3695_v26 }
0x13a9   :  { %3698 = vmatpush3.bf16.msra.mxu1 %v3695_v26 }
0x13aa   :  { %3690 = vmatpush3.bf16.msra.mxu0 %v3687_v39  ;;  %v3699_v39 = vpack.c.bf16 %v3122_v20, %v3121_v4 }
0x13ac   :  { %3700 = vmatprep.subr.bf16.mxu1 %v3699_v39 }
0x1470   :  { %v3457_v40 = vpop.f32.mrb[30].mxu0 }
0x1471   :  { %v2470_v41 = vpop.f32.mrb[31].mxu0 }
0x1472   :  { %2572 = vrot.lane.b32.xlu1 %v2470_v41, %s3905_s20 }
0x1474   :  { %v3464_v43 = vpop.f32.mrb[30].mxu1 }
0x1475   :  { %v2559_v51 = vpop.f32.mrb[31].mxu1 }
0x1476   :  { %2574 = vrot.lane.b32.xlu1 %v3457_v40, %s3905_s20  ;;  %2576 = vrot.lane.b32.xlu0 %v2559_v51, %s3905_s20 }
0x147a   :  { %2578 = vrot.lane.b32.xlu1 %v3464_v43, %s3905_s20 }
0x14e4   :  { %v2573_v56 = vpop.permute.xlu1 %2572 }
0x14e5   :  { %v2584_v59 = vsel %vm164_vm1, %v4537_v21, %v2573_v56  ;;  %v2600_v21 = vrot.slane %v4425_v9, %v1182_v29 }
0x14e6   :  { %3481 = vmatprep.mubr.msk.f32.mxu0 %vm48_vm0, %v2584_v59 }
0x14e8   :  { %v2575_v47 = vpop.permute.xlu1 %2574  ;;  %v2577_v52 = vpop.permute.xlu0 %2576 }
0x14e9   :  { %v2585_v60 = vsel %vm164_vm1, %v4535_v18, %v2575_v47  ;;  %v2586_v62 = vsel %vm164_vm1, %v4541_v24, %v2577_v52 }
0x14ea   :  { %3482 = vmatmul.mubr.msk.f32.vlgmr.msra.gmra.mrb[32].mxu0 %vm48_vm0, %v2585_v60 }
0x14eb   :  { %3484 = vmatprep.mubr.msk.f32.mxu0 %vm48_vm0, %v2586_v62 }
0x14ec   :  { %v2579_v17 = vpop.permute.xlu1 %2578 }
0x14ed   :  { %v2587_v5 = vsel %vm164_vm1, %v4539_v22, %v2579_v17 }
0x14ee   :  { %3485 = vmatmul.mubr.msk.f32.gmra.mrb[34].mxu0 %vm48_vm0, %v2587_v5 }
0x15bd   :  { %v3483_v46 = vpop.f32.mrb[32].mxu0 }
0x15be   :  { %v2685_v18 = vadd.f32 %v3483_v46, %v2600_v21  ;;  %v2679_v1 = vpop.f32.mrb[33].mxu0 }
0x15bf   :  { %v2680_v7 = vadd.f32 %v2679_v1, %v2600_v21 }
0x15c0   :  { %v4607_v24 = vadd.f32 %v2685_v18, %v4372_v6 }
0x15c1   :  { %v4610_v54 = vadd.f32 %v2680_v7, %v4374_v2  ;;  %v3486_v37 = vpop.f32.mrb[34].mxu0 }
0x15c2   :  { %v2689_v19 = vpop.f32.mrb[35].mxu0  ;;  %v2705_v22 = vsel %vm164_vm1, %v4607_v24, 0.0  ;;  %v2695_v10 = vadd.f32 %v3486_v37, %v2600_v21  ;;  %v2765_v37 = vrot.slane %v4425_v9, %v1347_v33  ;;  %v3125_v33 = vld [vmem:[%s4718_s8 + $0x60] sm:$0xff] }
0x15c3   :  { %v2690_v42 = vadd.f32 %v2689_v19, %v2600_v21  ;;  %2706 = vadd.xlane.f32.xlu1 %v2705_v22  ;;  %v2702_v29 = vsel %vm164_vm1, %v4610_v54, 0.0  ;;  %v2757_v21 = vrot.slane %v4425_v9, %v1339_v28 }
0x15c4   :  { %2703 = vadd.xlane.f32.xlu0 %v2702_v29  ;;  %v4620_v6 = vadd.f32 %v2695_v10, %v4382_v32  ;;  %v3123_v10 = vld [vmem:[%s4718_s8 + $0x50] sm:$0xff] }
0x15c5   :  { %v4617_v50 = vadd.f32 %v2690_v42, %v4384_v11  ;;  %v3124_v42 = vld [vmem:[%s4718_s8 + $0x58] sm:$0xff] }
0x15c6   :  { %v2711_v13 = vsel %vm164_vm1, %v4620_v6, 0.0 }
0x15c7   :  { %v2708_v2 = vsel %vm164_vm1, %v4617_v50, 0.0 }
0x15c8   :  { %2709 = vadd.xlane.f32.xlu0 %v2708_v2 }
0x15cc   :  { %2712 = vadd.xlane.f32.xlu0 %v2711_v13 }
0x1650   :  { %v2707_v58 = vpop.xlane.xlu1 %2706 }
0x1651   :  { %v2715_v61 = vmul.f32 0.03125, %v2707_v58  ;;  %v2704_v14 = vpop.xlane.xlu0 %2703  ;;  %v3703_v58 = vpack.c.bf16 %v3124_v42, %v3123_v10 }
0x1652   :  { %v2714_v15 = vmul.f32 0.03125, %v2704_v14  ;;  %v3126_v14 = vld [vmem:[%s4718_s8 + $0x68] sm:$0xff] }
0x1653   :  { %v2719_v44 = vsub.f32 %v4607_v24, %v2715_v61 }
0x1654   :  { %v2718_v11 = vsub.f32 %v4610_v54, %v2714_v15 }
0x1655   :  { %v2710_v45 = vpop.xlane.xlu0 %2709  ;;  %v2723_v48 = vmul.f32 %v2719_v44, %v2719_v44 }
0x1656   :  { %v2716_v32 = vmul.f32 0.03125, %v2710_v45  ;;  %v2722_v34 = vmul.f32 %v2718_v11, %v2718_v11  ;;  %v3707_v45 = vpack.c.bf16 %v3126_v14, %v3125_v33 }
0x1657   :  { %v2729_v35 = vsel %vm164_vm1, %v2723_v48, 0.0 }
0x1658   :  { %v2720_v36 = vsub.f32 %v4617_v50, %v2716_v32  ;;  %2730 = vadd.xlane.f32.xlu1 %v2729_v35  ;;  %v2726_v49 = vsel %vm164_vm1, %v2722_v34, 0.0  ;;  %v3127_v34 = vld [vmem:[%s4718_s8 + $0x70] sm:$0xff]  ;;  %v3128_v35 = vld [vmem:[%s4718_s8 + $0x78] sm:$0xff]  ;;  %s3906_s8 = smov [#allocation2]  }
0x1659   :  { %2727 = vadd.xlane.f32.xlu0 %v2726_v49  ;;  %v2713_v23 = vpop.xlane.xlu0 %2712  ;;  %v2778_v49 = vrot.slane %v4425_v9, %v1359_v38  ;;  %v2993_v38 = vrot.slane %v4425_v9, %v1573_v57  ;;  %s3007_s2 = sshll.u32 %s3906_s8, 4  ;;  %s3008_s2 = int_to_ptr.vmem [resolvable:$true] %s3007_s2 }
0x165a   :  { %v2717_v63 = vmul.f32 0.03125, %v2713_v23  ;;  %v2724_v0 = vmul.f32 %v2720_v36, %v2720_v36  ;;  %s3878_s22 = scalar_lea.vmem %s3008_s2, 512  ;;  %p3883_p1 = scmp.lt.s32.totalorder %s3008_s2, %s3008_s2 }
0x165b   :  { %p3879_p0 = scmp.ne.s32.totalorder %s3008_s2, %s3878_s22  ;;  %p3884_p2 = scmp.lt.s32.totalorder %s3878_s22, %s3878_s22 }
0x165c   :  { %v2721_v31 = vsub.f32 %v4620_v6, %v2717_v63  ;;  %v2732_v16 = vsel %vm164_vm1, %v2724_v0, 0.0 }
0x165d   :  { %2733 = vadd.xlane.f32.xlu0 %v2732_v16  ;;  %p3885_p3 = por %p3884_p2, %p3883_p1 }
0x165e   :  { %v2725_v8 = vmul.f32 %v2721_v31, %v2721_v31 }
0x165f   :  { %p3886_p4 = pnand %p3885_p3, %p3879_p0 }
0x1660   :  { %v2735_v27 = vsel %vm164_vm1, %v2725_v8, 0.0 }
0x1661   :  { %2736 = vadd.xlane.f32.xlu1 %v2735_v27 }
0x16e5   :  { %v2731_v40 = vpop.xlane.xlu1 %2730 }
0x16e6   :  { %v2739_v41 = vmul.f32 0.03125, %v2731_v40  ;;  %v2728_v43 = vpop.xlane.xlu0 %2727 }
0x16e7   :  { %v2738_v51 = vmul.f32 0.03125, %v2728_v43 }
0x16e8   :  { %v2743_v56 = vadd.f32 1e-05, %v2739_v41 }
0x16e9   :  { %v2742_v59 = vadd.f32 1e-05, %v2738_v51 }
0x16ea   :  { %3870 = vrsqrt.f32 %v2743_v56  ;;  %v2734_v47 = vpop.xlane.xlu0 %2733 }
0x16eb   :  { %3872 = vrsqrt.f32 %v2742_v59  ;;  %v2740_v60 = vmul.f32 0.03125, %v2734_v47 }
0x16ed   :  { %v2744_v52 = vadd.f32 1e-05, %v2740_v60 }
0x16ee   :  { %v2737_v62 = vpop.xlane.xlu1 %2736 }
0x16ef   :  { %3874 = vrsqrt.f32 %v2744_v52  ;;  %v2741_v17 = vmul.f32 0.03125, %v2737_v62 }
0x16f1   :  { %v2745_v5 = vadd.f32 1e-05, %v2741_v17 }
0x16f3   :  { %3876 = vrsqrt.f32 %v2745_v5 }
0x16f4   :  { %v3871_v46 = vpop.eup %3870 }
0x16f5   :  { %v3873_v18 = vpop.eup %3872  ;;  %v2751_v1 = vmul.f32 %v3871_v46, %v2719_v44 }
0x16f6   :  { %v2750_v7 = vmul.f32 %v3873_v18, %v2718_v11 }
0x16f7   :  { %v2759_v19 = vmul.f32 %v2757_v21, %v2751_v1 }
0x16f8   :  { %v2758_v22 = vmul.f32 %v2757_v21, %v2750_v7 }
0x16f9   :  { %v3875_v29 = vpop.eup %3874  ;;  %v2767_v13 = vadd.f32 %v2765_v37, %v2759_v19 }
0x16fa   :  { %v2766_v28 = vadd.f32 %v2765_v37, %v2758_v22  ;;  %v2752_v2 = vmul.f32 %v3875_v29, %v2720_v36  ;;  %v3711_v36 = vpack.c.bf16 %v3128_v35, %v3127_v34 }
0x16fc   :  { %3495 = vmatprep.mubr.msk.f32.mxu1 %vm164_vm1, %v2766_v28  ;;  %v2760_v61 = vmul.f32 %v2757_v21, %v2752_v2 }
0x16fd   :  { %v3877_v15 = vpop.eup %3876  ;;  %3496 = vmatmul.mubr.msk.f32.vlgmr.msra.gmra.mrb[32].mxu1 %vm164_vm1, %v2767_v13 }
0x16fe   :  { %v2768_v44 = vadd.f32 %v2765_v37, %v2760_v61  ;;  %v2753_v11 = vmul.f32 %v3877_v15, %v2721_v31  ;;  %3702 = vmatpush3.bf16.msra.mxu1 %v3699_v39 }
0x16ff   :  { %3704 = vmatprep.subr.bf16.mxu1 %v3703_v58 }
0x1700   :  { %3498 = vmatprep.mubr.msk.f32.mxu1 %vm164_vm1, %v2768_v44  ;;  %v2761_v48 = vmul.f32 %v2757_v21, %v2753_v11 }
0x1702   :  { %v2769_v32 = vadd.f32 %v2765_v37, %v2761_v48  ;;  %3706 = vmatpush3.bf16.msra.mxu1 %v3703_v58 }
0x1703   :  { %3708 = vmatprep.subr.bf16.mxu1 %v3707_v45 }
0x1704   :  { %3499 = vmatmul.mubr.msk.f32.gmra.mrb[34].mxu1 %vm164_vm1, %v2769_v32 }
0x1706   :  { %3710 = vmatpush3.bf16.msra.mxu1 %v3707_v45 }
0x1707   :  { %3712 = vmatprep.subr.bf16.mxu1 %v3711_v36 }
0x170a   :  { %3714 = vmatpush3.bf16.msra.mxu1 %v3711_v36 }
0x17d0   :  { %v3497_v23 = vpop.f32.mrb[32].mxu1 }
0x17d1   :  { %v2863_v63 = vadd.f32 %v3497_v23, %v2778_v49  ;;  %v2857_v0 = vpop.f32.mrb[33].mxu1 }
0x17d2   :  { %v2858_v31 = vadd.f32 %v2857_v0, %v2778_v49 }
0x17d3   :  { %v2877_v8 = vmax.f32 %v2863_v63, 0.0 }
0x17d4   :  { %v2876_v16 = vmax.f32 %v2858_v31, 0.0 }
0x17d6   :  { %3517 = vmatprep.mubr.msk.f32.mxu1 %vm48_vm0, %v2876_v16 }
0x17d7   :  { %v3500_v27 = vpop.f32.mrb[34].mxu1  ;;  %3518 = vmatmul.mubr.msk.f32.vlgmr.msra.gmra.mrb[36].mxu1 %vm48_vm0, %v2877_v8 }
0x17d8   :  { %v2873_v3 = vadd.f32 %v3500_v27, %v2778_v49  ;;  %v2867_v25 = vpop.f32.mrb[35].mxu1 }
0x17d9   :  { %v2868_v30 = vadd.f32 %v2867_v25, %v2778_v49 }
0x17da   :  { %v2879_v55 = vmax.f32 %v2873_v3, 0.0 }
0x17db   :  { %v2878_v53 = vmax.f32 %v2868_v30, 0.0 }
0x17dd   :  { %3520 = vmatprep.mubr.msk.f32.mxu1 %vm48_vm0, %v2878_v53 }
0x17de   :  { %3521 = vmatmul.mubr.msk.f32.gmra.mrb[38].mxu1 %vm48_vm0, %v2879_v55 }
0x18aa   :  { %v3519_v26 = vpop.f32.mrb[36].mxu1 }
0x18ab   :  { %v2987_v4 = vadd.f32 %v3519_v26, %v4607_v24  ;;  %v2967_v20 = vpop.f32.mrb[37].mxu1 }
0x18ac   :  { %v2986_v39 = vadd.f32 %v2967_v20, %v4610_v54 }
0x18ad   :  { %v2995_v40 = vadd.f32 %v2993_v38, %v2987_v4 }
0x18ae   :  { %v2994_v41 = vadd.f32 %v2993_v38, %v2986_v39 }
0x18af   :  { %2999 = vst.msk [vmem:[#allocation2 + $0x8] sm:$0xff] %vm164_vm1, %v2995_v40 }
0x18b0   :  { %2998 = vst.msk [vmem:[#allocation2] sm:$0xff] %vm164_vm1, %v2994_v41 }
0x18b1   :  { %v3522_v43 = vpop.f32.mrb[38].mxu1 }
0x18b2   :  { %v2989_v51 = vadd.f32 %v3522_v43, %v4620_v6  ;;  %v2977_v12 = vpop.f32.mrb[39].mxu1 }
0x18b3   :  { %v2988_v57 = vadd.f32 %v2977_v12, %v4617_v50 }
0x18b4   :  { %v2997_v9 = vadd.f32 %v2993_v38, %v2989_v51 }
0x18b5   :  { %v2996_v24 = vadd.f32 %v2993_v38, %v2988_v57 }
0x18b6   :  { %3001 = vst.msk [vmem:[#allocation2 + $0x18] sm:$0xff] %vm164_vm1, %v2997_v9 }
0x18b7   :  { %3000 = vst.msk [vmem:[#allocation2 + $0x10] sm:$0xff] %vm164_vm1, %v2996_v24 }
0x18b8   :  { %3889 = shalt.err (!%p3886_p4)
}
0x18b9   :  { %s3890_s25 = scalar_lea.hbm %s4720_s10, 512 }
0x18ba   :  { %p3891_p5 = scmp.ne.s32.totalorder %s4720_s10, %s3890_s25  ;;  %p3894_p6 = scmp.lt.u32.totalorder %s3890_s25, %s4720_s10 }
0x18bc   :  { %p3896_p7 = pnand %p3894_p6, %p3891_p5 }
0x18be   :  { %3899 = shalt.err (!%p3896_p7)
}
0x18bf   :  { %s3907_s28 = smov 128   ;;  %s3908_s29 = smov 8  }
0x18c0   :  { %3013 = dma.vmem_to_hbm [thread:$0]  %s3008_s2, 512, %s4720_s10, [#allocation3], %s3907_s28, %s3907_s28, %s3908_s29  }
0x18c1   :  { %3900 = dma.done.wait [#allocation3], 512  }
0x18c2   :  { %3901 = vsyncadd [#allocation3], 4294966784 }
0x18c3   :  { %3017 = vsyncpa [#allocation3], 1 }

</bundles_post_ra>
